<compile_context>
chip_gen: v5e
topology: v5e:2x2
jax: 0.10.0
libtpu: 0.0.40
codegen_flags: <defaults>
</compile_context>

<pallas_src>
import jax
import jax.numpy as jnp
from jax.experimental import pallas as pl
from jax.experimental.pallas import tpu as pltpu


def _sigmoid(v):
    # exact sigmoid via one tanh EUP push (instead of exp + reciprocal)
    return 0.5 * (jnp.tanh(0.5 * v) + 1.0)


def attn_decoder_decode_kernel(tok_ref, emb_ref, h0_ref, enc_ref,
                               wc_ref, wih_ref, whh_ref, wout_ref, bias_ref,
                               logp_ref, hid_ref, attn_ref):
    V, H = emb_ref.shape
    T = logp_ref.shape[0]

    # ---- loop-invariant loads / slices (hoisted out of the decode loop) ----
    emb_tbl = emb_ref[...]                 # (V, H)  embedding table
    enc = enc_ref[...]                     # (L, H)  encoder outputs
    wc = wc_ref[...]                       # (2H, H) rows [0:H] multiply embedded, [H:2H] multiply attn
    wc_e, wc_a = wc[:H, :], wc[H:, :]
    wih = wih_ref[...]                     # (H, 3H) fused GRU input weights  (r|z|n)
    whh = whh_ref[...]                     # (H, 3H) fused GRU hidden weights (r|z|n)
    wout = wout_ref[...]                   # (H, V)
    b = bias_ref[...]                      # (1, H + 3H + 3H + V) packed biases
    bc = b[:, :H]
    b_ih = b[:, H:4 * H]
    b_hh = b[:, 4 * H:7 * H]
    b_out = b[:, 7 * H:7 * H + V]
    lane_v = jax.lax.broadcasted_iota(jnp.int32, (1, V), 1)

    def step(t, h):
        # --- embedding lookup as a one-hot matmul (dropout p=0.1 is identity in eval mode) ---
        tok = tok_ref[t]
        onehot = (lane_v == tok).astype(jnp.float32)                              # (1, V)
        emb = jnp.dot(onehot, emb_tbl, preferred_element_type=jnp.float32)        # (1, H)

        # --- attention: softmax(h @ enc^T); contract H without materializing enc^T ---
        scores = jax.lax.dot_general(h, enc, (((1,), (1,)), ((), ())),
                                     preferred_element_type=jnp.float32)          # (1, L)
        m = jnp.max(scores, axis=-1, keepdims=True)
        e = jnp.exp(scores - m)
        attn_w = e * pl.reciprocal(jnp.sum(e, axis=-1, keepdims=True), approx=False)
        attn_applied = jnp.dot(attn_w, enc, preferred_element_type=jnp.float32)   # (1, H)

        # --- attn_combine + relu: cat(emb, attn_applied) @ Wc^T + bc (split dots, no concat) ---
        x = jnp.maximum(
            jnp.dot(emb, wc_e, preferred_element_type=jnp.float32)
            + jnp.dot(attn_applied, wc_a, preferred_element_type=jnp.float32)
            + bc, 0.0)

        # --- GRU cell: two fused (H,3H) matmuls, PyTorch gate order r, z, n ---
        gi = jnp.dot(x, wih, preferred_element_type=jnp.float32) + b_ih           # (1, 3H)
        gh = jnp.dot(h, whh, preferred_element_type=jnp.float32) + b_hh           # (1, 3H)
        r = _sigmoid(gi[:, :H] + gh[:, :H])
        z = _sigmoid(gi[:, H:2 * H] + gh[:, H:2 * H])
        n = jnp.tanh(gi[:, 2 * H:] + r * gh[:, 2 * H:])
        h_new = (1.0 - z) * n + z * h

        # --- output projection + log_softmax ---
        logits = jnp.dot(h_new, wout, preferred_element_type=jnp.float32) + b_out
        lm = jnp.max(logits, axis=-1, keepdims=True)
        shifted = logits - lm
        logp = shifted - jnp.log(jnp.sum(jnp.exp(shifted), axis=-1, keepdims=True))

        # --- per-step writebacks (dynamic index on the leading axis) ---
        logp_ref[t] = logp
        hid_ref[t] = h_new
        attn_ref[t] = attn_w
        return h_new

    jax.lax.fori_loop(0, T, step, h0_ref[...], unroll=True)


def init_params(key, hidden_size, output_size):
    """Deterministic synthetic parameters in the PyTorch module's native layouts."""
    H, V = hidden_size, output_size
    ks = jax.random.split(key, 8)
    s = 1.0 / jnp.sqrt(jnp.float32(H))
    return {
        "embedding": jax.random.uniform(ks[0], (V, H), jnp.float32, -s, s),
        # attn_combine : Linear(2H -> H), PyTorch weight shape (H, 2H)
        "w_combine": jax.random.uniform(ks[1], (H, 2 * H), jnp.float32, -s, s),
        "b_combine": jax.random.uniform(ks[2], (H,), jnp.float32, -s, s),
        # GRU : weight_ih (3H, H), weight_hh (3H, H), biases (3H,), gate order r,z,n
        "w_ih": jax.random.uniform(ks[3], (3 * H, H), jnp.float32, -s, s),
        "w_hh": jax.random.uniform(ks[4], (3 * H, H), jnp.float32, -s, s),
        "b_ih": jax.random.uniform(ks[5], (3 * H,), jnp.float32, -s, s),
        "b_hh": jax.random.uniform(ks[6], (3 * H,), jnp.float32, -s, s),
        # out : Linear(H -> V), PyTorch weight shape (V, H)
        "w_out": jax.random.uniform(ks[7], (V, H), jnp.float32, -s, s),
        "b_out": jnp.zeros((V,), jnp.float32),
        # NOTE: self.attn (Linear(2H, max_length)) is unused in forward() and omitted.
    }


def prepare_params(params):
    """One-time layout prep (NOT redone per decode call): transpose weights to (in, out)
    and pack all bias rows into a single (1, H+3H+3H+V) array."""
    biases = jnp.concatenate([params["b_combine"], params["b_ih"],
                              params["b_hh"], params["b_out"]]).reshape(1, -1)
    return {
        "emb": params["embedding"],          # (V, H)
        "wc": params["w_combine"].T,         # (2H, H)
        "wih": params["w_ih"].T,             # (H, 3H)
        "whh": params["w_hh"].T,             # (H, 3H)
        "wout": params["w_out"].T,           # (H, V)
        "biases": biases,                    # (1, H + 3H + 3H + V)
    }


@jax.jit
def attn_decoder_decode(tokens, hidden, encoder_outputs, prep):
    """Runs T teacher-forced AttnDecoderRNN.forward steps in ONE Pallas launch.

    Args:
      tokens: (T,) int32 decoder input token ids (teacher forcing).
      hidden: (1, 1, H) initial hidden state.
      encoder_outputs: (L, 1, H) encoder states (seq-first, batch=1).
      prep: dict from prepare_params().
    Returns:
      (T, V) per-step log-softmax outputs, (T, H) per-step hidden states,
      (T, L) per-step attention weights.
    """
    T = tokens.shape[0]
    L = encoder_outputs.shape[0]
    H = hidden.shape[-1]
    V = prep["wout"].shape[1]

    h0 = hidden.reshape(1, H)
    enc = encoder_outputs.reshape(L, H)

    vspec = pl.BlockSpec(memory_space=pltpu.MemorySpace.VMEM)
    sspec = pl.BlockSpec(memory_space=pltpu.MemorySpace.SMEM)

    logp, hids, attn = pl.pallas_call(
        attn_decoder_decode_kernel,
        out_shape=(
            jax.ShapeDtypeStruct((T, 1, V), jnp.float32),   # per-step log-softmax outputs
            jax.ShapeDtypeStruct((T, 1, H), jnp.float32),   # per-step hidden states
            jax.ShapeDtypeStruct((T, 1, L), jnp.float32),   # per-step attention weights
        ),
        in_specs=[sspec] + [vspec] * 8,
        out_specs=(vspec, vspec, vspec),
    )(tokens, prep["emb"], h0, enc,
      prep["wc"], prep["wih"], prep["whh"], prep["wout"], prep["biases"])

    return logp[:, 0, :], hids[:, 0, :], attn[:, 0, :]


def reference_decode(tokens, hidden, encoder_outputs, params):
    """Pure-JAX per-step reference using the PyTorch layouts (correctness check)."""
    H = hidden.shape[-1]
    L = encoder_outputs.shape[0]
    h = hidden.reshape(1, H)
    enc = encoder_outputs.reshape(L, H)
    outs, hs, attns = [], [], []
    for t in range(tokens.shape[0]):
        emb = params["embedding"][tokens[t]].reshape(1, H)
        attn_w = jax.nn.softmax(h @ enc.T, axis=-1)
        attn_applied = attn_w @ enc
        x = jnp.concatenate([emb, attn_applied], axis=1)
        x = jax.nn.relu(x @ params["w_combine"].T + params["b_combine"])
        gi = x @ params["w_ih"].T + params["b_ih"]
        gh = h @ params["w_hh"].T + params["b_hh"]
        r = jax.nn.sigmoid(gi[:, :H] + gh[:, :H])
        z = jax.nn.sigmoid(gi[:, H:2 * H] + gh[:, H:2 * H])
        n = jnp.tanh(gi[:, 2 * H:] + r * gh[:, 2 * H:])
        h = (1.0 - z) * n + z * h
        logits = h @ params["w_out"].T + params["b_out"]
        outs.append(jax.nn.log_softmax(logits, axis=-1))
        hs.append(h)
        attns.append(attn_w)
    return (jnp.concatenate(outs, axis=0),
            jnp.concatenate(hs, axis=0),
            jnp.concatenate(attns, axis=0))


if __name__ == "__main__":
    H = 32     # hidden_size
    V = 40     # output_size (vocab)
    L = 8      # encoder sequence length (<= max_length)
    T = 6      # decode steps fused into one kernel launch

    key = jax.random.PRNGKey(0)
    k_params, k_hid, k_enc, k_tok = jax.random.split(key, 4)

    params = init_params(k_params, H, V)
    prep = prepare_params(params)                 # one-time transposes / bias packing
    tokens = jax.random.randint(k_tok, (T,), 0, V, dtype=jnp.int32)
    hidden = jax.random.normal(k_hid, (1, 1, H), jnp.float32)
    encoder_outputs = jax.random.normal(k_enc, (L, 1, H), jnp.float32)

    logp, hids, attn = attn_decoder_decode(tokens, hidden, encoder_outputs, prep)
    jax.block_until_ready((logp, hids, attn))

    h_final = hids[-1].reshape(1, 1, H)           # final hidden state in the module's layout
    assert logp.shape == (T, V) and hids.shape == (T, H) and attn.shape == (T, L)
    assert h_final.shape == (1, 1, H)
    # self-consistency: softmax rows normalize to 1
    assert jnp.allclose(jnp.sum(jnp.exp(logp), axis=-1), 1.0, atol=1e-4)
    assert jnp.allclose(jnp.sum(attn, axis=-1), 1.0, atol=1e-5)

    # pure-JAX reference (per-step loop, PyTorch layouts); loose tolerance covers any
    # MXU multi-pass f32 rounding differences vs the XLA reference matmuls.
    with jax.default_matmul_precision("float32"):
        ref_logp, ref_hids, ref_attn = reference_decode(tokens, hidden, encoder_outputs, params)
    assert jnp.allclose(logp, ref_logp, atol=2e-2, rtol=2e-2)
    assert jnp.allclose(hids, ref_hids, atol=2e-2, rtol=2e-2)
    assert jnp.allclose(attn, ref_attn, atol=2e-2, rtol=2e-2)

    print("KERNEL_OK")
</pallas_src>

<mosaic_0001>
module attributes {stable_mosaic.version = 11 : i64} {
  func.func @attn_decoder_decode_kernel(%arg0: memref<6xi32, #tpu.memory_space<smem>>, %arg1: memref<40x32xf32, #tpu.memory_space<vmem>>, %arg2: memref<1x32xf32, #tpu.memory_space<vmem>>, %arg3: memref<8x32xf32, #tpu.memory_space<vmem>>, %arg4: memref<64x32xf32, #tpu.memory_space<vmem>>, %arg5: memref<32x96xf32, #tpu.memory_space<vmem>>, %arg6: memref<32x96xf32, #tpu.memory_space<vmem>>, %arg7: memref<32x40xf32, #tpu.memory_space<vmem>>, %arg8: memref<1x264xf32, #tpu.memory_space<vmem>>, %arg9: memref<6x1x40xf32, #tpu.memory_space<vmem>>, %arg10: memref<6x1x32xf32, #tpu.memory_space<vmem>>, %arg11: memref<6x1x8xf32, #tpu.memory_space<vmem>>) attributes {dimension_semantics = [], scalar_prefetch = 0 : i64, scratch_operands = 0 : i64, tpu.core_type = #tpu.core_type<tc>} {
    %c0 = arith.constant 0 : index
    %c0_0 = arith.constant 0 : index
    %0 = vector.load %arg1[%c0, %c0_0] : memref<40x32xf32, #tpu.memory_space<vmem>>, vector<40x32xf32>
    %c0_1 = arith.constant 0 : index
    %c0_2 = arith.constant 0 : index
    %1 = vector.load %arg3[%c0_1, %c0_2] : memref<8x32xf32, #tpu.memory_space<vmem>>, vector<8x32xf32>
    %c0_3 = arith.constant 0 : index
    %c0_4 = arith.constant 0 : index
    %2 = vector.load %arg4[%c0_3, %c0_4] : memref<64x32xf32, #tpu.memory_space<vmem>>, vector<64x32xf32>
    %3 = vector.extract_strided_slice %2 {offsets = [0, 0], sizes = [32, 32], strides = [1, 1]} : vector<64x32xf32> to vector<32x32xf32>
    %4 = vector.extract_strided_slice %2 {offsets = [32, 0], sizes = [32, 32], strides = [1, 1]} : vector<64x32xf32> to vector<32x32xf32>
    %c0_5 = arith.constant 0 : index
    %c0_6 = arith.constant 0 : index
    %5 = vector.load %arg5[%c0_5, %c0_6] : memref<32x96xf32, #tpu.memory_space<vmem>>, vector<32x96xf32>
    %c0_7 = arith.constant 0 : index
    %c0_8 = arith.constant 0 : index
    %6 = vector.load %arg6[%c0_7, %c0_8] : memref<32x96xf32, #tpu.memory_space<vmem>>, vector<32x96xf32>
    %c0_9 = arith.constant 0 : index
    %c0_10 = arith.constant 0 : index
    %7 = vector.load %arg7[%c0_9, %c0_10] : memref<32x40xf32, #tpu.memory_space<vmem>>, vector<32x40xf32>
    %c0_11 = arith.constant 0 : index
    %c0_12 = arith.constant 0 : index
    %8 = vector.load %arg8[%c0_11, %c0_12] : memref<1x264xf32, #tpu.memory_space<vmem>>, vector<1x264xf32>
    %9 = vector.extract_strided_slice %8 {offsets = [0, 0], sizes = [1, 32], strides = [1, 1]} : vector<1x264xf32> to vector<1x32xf32>
    %10 = vector.extract_strided_slice %8 {offsets = [0, 32], sizes = [1, 96], strides = [1, 1]} : vector<1x264xf32> to vector<1x96xf32>
    %11 = vector.extract_strided_slice %8 {offsets = [0, 128], sizes = [1, 96], strides = [1, 1]} : vector<1x264xf32> to vector<1x96xf32>
    %12 = vector.extract_strided_slice %8 {offsets = [0, 224], sizes = [1, 40], strides = [1, 1]} : vector<1x264xf32> to vector<1x40xf32>
    %13 = tpu.iota {dimensions = array<i32: 1>} : vector<1x40xi32>
    %c0_13 = arith.constant 0 : index
    %c0_14 = arith.constant 0 : index
    %14 = vector.load %arg2[%c0_13, %c0_14] : memref<1x32xf32, #tpu.memory_space<vmem>>, vector<1x32xf32>
    %c0_i32 = arith.constant 0 : i32
    %15 = arith.index_cast %c0_i32 : i32 to index
    %16 = memref.load %arg0[%15] : memref<6xi32, #tpu.memory_space<smem>>
    %17 = vector.broadcast %16 : i32 to vector<1x40xi32>
    %18 = arith.cmpi eq, %13, %17 : vector<1x40xi32>
    %19 = arith.extui %18 : vector<1x40xi1> to vector<1x40xi32>
    %20 = arith.sitofp %19 : vector<1x40xi32> to vector<1x40xf32>
    %cst = arith.constant dense<0.000000e+00> : vector<1x32xf32>
    %21 = tpu.matmul %20, %0, %cst {dimension_numbers = #tpu.dot_dimension_numbers<[1], [0], [0], [1], [0, 0, 1, 1], [], []>} : vector<1x40xf32>, vector<40x32xf32>, vector<1x32xf32> -> vector<1x32xf32>
    %cst_15 = arith.constant dense<0.000000e+00> : vector<1x8xf32>
    %22 = tpu.matmul %14, %1, %cst_15 {dimension_numbers = #tpu.dot_dimension_numbers<[1], [1], [0], [0], [0, 0, 1, 0], [], []>} : vector<1x32xf32>, vector<8x32xf32>, vector<1x8xf32> -> vector<1x8xf32>
    %cst_16 = arith.constant dense<0xFF800000> : vector<1xf32>
    %23 = vector.multi_reduction <maximumf>, %22, %cst_16 [1] : vector<1x8xf32> to vector<1xf32>
    %24 = vector.shape_cast %23 : vector<1xf32> to vector<1x1xf32>
    %25 = vector.broadcast %24 : vector<1x1xf32> to vector<1x8xf32>
    %26 = arith.subf %22, %25 : vector<1x8xf32>
    %27 = math.exp %26 : vector<1x8xf32>
    %cst_17 = arith.constant dense<0.000000e+00> : vector<1xf32>
    %28 = vector.multi_reduction <add>, %27, %cst_17 [1] : vector<1x8xf32> to vector<1xf32>
    %29 = vector.shape_cast %28 : vector<1xf32> to vector<1x1xf32>
    %30 = tpu.reciprocal %29 : vector<1x1xf32> -> vector<1x1xf32>
    %31 = vector.broadcast %30 : vector<1x1xf32> to vector<1x8xf32>
    %32 = arith.mulf %27, %31 : vector<1x8xf32>
    %cst_18 = arith.constant dense<0.000000e+00> : vector<1x32xf32>
    %33 = tpu.matmul %32, %1, %cst_18 {dimension_numbers = #tpu.dot_dimension_numbers<[1], [0], [0], [1], [0, 0, 1, 1], [], []>} : vector<1x8xf32>, vector<8x32xf32>, vector<1x32xf32> -> vector<1x32xf32>
    %cst_19 = arith.constant dense<0.000000e+00> : vector<1x32xf32>
    %34 = tpu.matmul %21, %3, %cst_19 {dimension_numbers = #tpu.dot_dimension_numbers<[1], [0], [0], [1], [0, 0, 1, 1], [], []>} : vector<1x32xf32>, vector<32x32xf32>, vector<1x32xf32> -> vector<1x32xf32>
    %cst_20 = arith.constant dense<0.000000e+00> : vector<1x32xf32>
    %35 = tpu.matmul %33, %4, %cst_20 {dimension_numbers = #tpu.dot_dimension_numbers<[1], [0], [0], [1], [0, 0, 1, 1], [], []>} : vector<1x32xf32>, vector<32x32xf32>, vector<1x32xf32> -> vector<1x32xf32>
    %36 = arith.addf %34, %35 : vector<1x32xf32>
    %37 = arith.addf %36, %9 : vector<1x32xf32>
    %cst_21 = arith.constant 0.000000e+00 : f32
    %38 = vector.broadcast %cst_21 : f32 to vector<1x32xf32>
    %39 = arith.maximumf %37, %38 : vector<1x32xf32>
    %cst_22 = arith.constant dense<0.000000e+00> : vector<1x96xf32>
    %40 = tpu.matmul %39, %5, %cst_22 {dimension_numbers = #tpu.dot_dimension_numbers<[1], [0], [0], [1], [0, 0, 1, 1], [], []>} : vector<1x32xf32>, vector<32x96xf32>, vector<1x96xf32> -> vector<1x96xf32>
    %41 = arith.addf %40, %10 : vector<1x96xf32>
    %cst_23 = arith.constant dense<0.000000e+00> : vector<1x96xf32>
    %42 = tpu.matmul %14, %6, %cst_23 {dimension_numbers = #tpu.dot_dimension_numbers<[1], [0], [0], [1], [0, 0, 1, 1], [], []>} : vector<1x32xf32>, vector<32x96xf32>, vector<1x96xf32> -> vector<1x96xf32>
    %43 = arith.addf %42, %11 : vector<1x96xf32>
    %44 = vector.extract_strided_slice %41 {offsets = [0, 0], sizes = [1, 32], strides = [1, 1]} : vector<1x96xf32> to vector<1x32xf32>
    %45 = vector.extract_strided_slice %43 {offsets = [0, 0], sizes = [1, 32], strides = [1, 1]} : vector<1x96xf32> to vector<1x32xf32>
    %46 = arith.addf %44, %45 : vector<1x32xf32>
    %cst_24 = arith.constant 5.000000e-01 : f32
    %47 = vector.broadcast %cst_24 : f32 to vector<1x32xf32>
    %48 = arith.mulf %47, %46 : vector<1x32xf32>
    %49 = math.tanh %48 : vector<1x32xf32>
    %cst_25 = arith.constant 1.000000e+00 : f32
    %50 = vector.broadcast %cst_25 : f32 to vector<1x32xf32>
    %51 = arith.addf %49, %50 : vector<1x32xf32>
    %cst_26 = arith.constant 5.000000e-01 : f32
    %52 = vector.broadcast %cst_26 : f32 to vector<1x32xf32>
    %53 = arith.mulf %52, %51 : vector<1x32xf32>
    %54 = vector.extract_strided_slice %41 {offsets = [0, 32], sizes = [1, 32], strides = [1, 1]} : vector<1x96xf32> to vector<1x32xf32>
    %55 = vector.extract_strided_slice %43 {offsets = [0, 32], sizes = [1, 32], strides = [1, 1]} : vector<1x96xf32> to vector<1x32xf32>
    %56 = arith.addf %54, %55 : vector<1x32xf32>
    %cst_27 = arith.constant 5.000000e-01 : f32
    %57 = vector.broadcast %cst_27 : f32 to vector<1x32xf32>
    %58 = arith.mulf %57, %56 : vector<1x32xf32>
    %59 = math.tanh %58 : vector<1x32xf32>
    %cst_28 = arith.constant 1.000000e+00 : f32
    %60 = vector.broadcast %cst_28 : f32 to vector<1x32xf32>
    %61 = arith.addf %59, %60 : vector<1x32xf32>
    %cst_29 = arith.constant 5.000000e-01 : f32
    %62 = vector.broadcast %cst_29 : f32 to vector<1x32xf32>
    %63 = arith.mulf %62, %61 : vector<1x32xf32>
    %64 = vector.extract_strided_slice %41 {offsets = [0, 64], sizes = [1, 32], strides = [1, 1]} : vector<1x96xf32> to vector<1x32xf32>
    %65 = vector.extract_strided_slice %43 {offsets = [0, 64], sizes = [1, 32], strides = [1, 1]} : vector<1x96xf32> to vector<1x32xf32>
    %66 = arith.mulf %53, %65 : vector<1x32xf32>
    %67 = arith.addf %64, %66 : vector<1x32xf32>
    %68 = math.tanh %67 : vector<1x32xf32>
    %cst_30 = arith.constant 1.000000e+00 : f32
    %69 = vector.broadcast %cst_30 : f32 to vector<1x32xf32>
    %70 = arith.subf %69, %63 : vector<1x32xf32>
    %71 = arith.mulf %70, %68 : vector<1x32xf32>
    %72 = arith.mulf %63, %14 : vector<1x32xf32>
    %73 = arith.addf %71, %72 : vector<1x32xf32>
    %cst_31 = arith.constant dense<0.000000e+00> : vector<1x40xf32>
    %74 = tpu.matmul %73, %7, %cst_31 {dimension_numbers = #tpu.dot_dimension_numbers<[1], [0], [0], [1], [0, 0, 1, 1], [], []>} : vector<1x32xf32>, vector<32x40xf32>, vector<1x40xf32> -> vector<1x40xf32>
    %75 = arith.addf %74, %12 : vector<1x40xf32>
    %cst_32 = arith.constant dense<0xFF800000> : vector<1xf32>
    %76 = vector.multi_reduction <maximumf>, %75, %cst_32 [1] : vector<1x40xf32> to vector<1xf32>
    %77 = vector.shape_cast %76 : vector<1xf32> to vector<1x1xf32>
    %78 = vector.broadcast %77 : vector<1x1xf32> to vector<1x40xf32>
    %79 = arith.subf %75, %78 : vector<1x40xf32>
    %80 = math.exp %79 : vector<1x40xf32>
    %cst_33 = arith.constant dense<0.000000e+00> : vector<1xf32>
    %81 = vector.multi_reduction <add>, %80, %cst_33 [1] : vector<1x40xf32> to vector<1xf32>
    %82 = vector.shape_cast %81 : vector<1xf32> to vector<1x1xf32>
    %83 = math.log %82 : vector<1x1xf32>
    %84 = vector.broadcast %83 : vector<1x1xf32> to vector<1x40xf32>
    %85 = arith.subf %79, %84 : vector<1x40xf32>
    %86 = arith.index_cast %c0_i32 : i32 to index
    %c0_34 = arith.constant 0 : index
    %c0_35 = arith.constant 0 : index
    %87 = vector.load %arg9[%86, %c0_34, %c0_35] : memref<6x1x40xf32, #tpu.memory_space<vmem>>, vector<1x1x40xf32>
    %88 = vector.shape_cast %87 : vector<1x1x40xf32> to vector<1x40xf32>
    %89 = vector.shape_cast %85 : vector<1x40xf32> to vector<1x1x40xf32>
    tpu.vector_store %arg9[%86, %c0_34, %c0_35], %89 {strides = array<i32>} : memref<6x1x40xf32, #tpu.memory_space<vmem>>, vector<1x1x40xf32>,
    %90 = arith.index_cast %c0_i32 : i32 to index
    %c0_36 = arith.constant 0 : index
    %c0_37 = arith.constant 0 : index
    %91 = vector.load %arg10[%90, %c0_36, %c0_37] : memref<6x1x32xf32, #tpu.memory_space<vmem>>, vector<1x1x32xf32>
    %92 = vector.shape_cast %91 : vector<1x1x32xf32> to vector<1x32xf32>
    %93 = vector.shape_cast %73 : vector<1x32xf32> to vector<1x1x32xf32>
    tpu.vector_store %arg10[%90, %c0_36, %c0_37], %93 {strides = array<i32>} : memref<6x1x32xf32, #tpu.memory_space<vmem>>, vector<1x1x32xf32>,
    %94 = arith.index_cast %c0_i32 : i32 to index
    %c0_38 = arith.constant 0 : index
    %c0_39 = arith.constant 0 : index
    %95 = vector.load %arg11[%94, %c0_38, %c0_39] : memref<6x1x8xf32, #tpu.memory_space<vmem>>, vector<1x1x8xf32>
    %96 = vector.shape_cast %95 : vector<1x1x8xf32> to vector<1x8xf32>
    %97 = vector.shape_cast %32 : vector<1x8xf32> to vector<1x1x8xf32>
    tpu.vector_store %arg11[%94, %c0_38, %c0_39], %97 {strides = array<i32>} : memref<6x1x8xf32, #tpu.memory_space<vmem>>, vector<1x1x8xf32>,
    %c1_i32 = arith.constant 1 : i32
    %98 = arith.index_cast %c1_i32 : i32 to index
    %99 = memref.load %arg0[%98] : memref<6xi32, #tpu.memory_space<smem>>
    %100 = vector.broadcast %99 : i32 to vector<1x40xi32>
    %101 = arith.cmpi eq, %13, %100 : vector<1x40xi32>
    %102 = arith.extui %101 : vector<1x40xi1> to vector<1x40xi32>
    %103 = arith.sitofp %102 : vector<1x40xi32> to vector<1x40xf32>
    %cst_40 = arith.constant dense<0.000000e+00> : vector<1x32xf32>
    %104 = tpu.matmul %103, %0, %cst_40 {dimension_numbers = #tpu.dot_dimension_numbers<[1], [0], [0], [1], [0, 0, 1, 1], [], []>} : vector<1x40xf32>, vector<40x32xf32>, vector<1x32xf32> -> vector<1x32xf32>
    %cst_41 = arith.constant dense<0.000000e+00> : vector<1x8xf32>
    %105 = tpu.matmul %73, %1, %cst_41 {dimension_numbers = #tpu.dot_dimension_numbers<[1], [1], [0], [0], [0, 0, 1, 0], [], []>} : vector<1x32xf32>, vector<8x32xf32>, vector<1x8xf32> -> vector<1x8xf32>
    %cst_42 = arith.constant dense<0xFF800000> : vector<1xf32>
    %106 = vector.multi_reduction <maximumf>, %105, %cst_42 [1] : vector<1x8xf32> to vector<1xf32>
    %107 = vector.shape_cast %106 : vector<1xf32> to vector<1x1xf32>
    %108 = vector.broadcast %107 : vector<1x1xf32> to vector<1x8xf32>
    %109 = arith.subf %105, %108 : vector<1x8xf32>
    %110 = math.exp %109 : vector<1x8xf32>
    %cst_43 = arith.constant dense<0.000000e+00> : vector<1xf32>
    %111 = vector.multi_reduction <add>, %110, %cst_43 [1] : vector<1x8xf32> to vector<1xf32>
    %112 = vector.shape_cast %111 : vector<1xf32> to vector<1x1xf32>
    %113 = tpu.reciprocal %112 : vector<1x1xf32> -> vector<1x1xf32>
    %114 = vector.broadcast %113 : vector<1x1xf32> to vector<1x8xf32>
    %115 = arith.mulf %110, %114 : vector<1x8xf32>
    %cst_44 = arith.constant dense<0.000000e+00> : vector<1x32xf32>
    %116 = tpu.matmul %115, %1, %cst_44 {dimension_numbers = #tpu.dot_dimension_numbers<[1], [0], [0], [1], [0, 0, 1, 1], [], []>} : vector<1x8xf32>, vector<8x32xf32>, vector<1x32xf32> -> vector<1x32xf32>
    %cst_45 = arith.constant dense<0.000000e+00> : vector<1x32xf32>
    %117 = tpu.matmul %104, %3, %cst_45 {dimension_numbers = #tpu.dot_dimension_numbers<[1], [0], [0], [1], [0, 0, 1, 1], [], []>} : vector<1x32xf32>, vector<32x32xf32>, vector<1x32xf32> -> vector<1x32xf32>
    %cst_46 = arith.constant dense<0.000000e+00> : vector<1x32xf32>
    %118 = tpu.matmul %116, %4, %cst_46 {dimension_numbers = #tpu.dot_dimension_numbers<[1], [0], [0], [1], [0, 0, 1, 1], [], []>} : vector<1x32xf32>, vector<32x32xf32>, vector<1x32xf32> -> vector<1x32xf32>
    %119 = arith.addf %117, %118 : vector<1x32xf32>
    %120 = arith.addf %119, %9 : vector<1x32xf32>
    %cst_47 = arith.constant 0.000000e+00 : f32
    %121 = vector.broadcast %cst_47 : f32 to vector<1x32xf32>
    %122 = arith.maximumf %120, %121 : vector<1x32xf32>
    %cst_48 = arith.constant dense<0.000000e+00> : vector<1x96xf32>
    %123 = tpu.matmul %122, %5, %cst_48 {dimension_numbers = #tpu.dot_dimension_numbers<[1], [0], [0], [1], [0, 0, 1, 1], [], []>} : vector<1x32xf32>, vector<32x96xf32>, vector<1x96xf32> -> vector<1x96xf32>
    %124 = arith.addf %123, %10 : vector<1x96xf32>
    %cst_49 = arith.constant dense<0.000000e+00> : vector<1x96xf32>
    %125 = tpu.matmul %73, %6, %cst_49 {dimension_numbers = #tpu.dot_dimension_numbers<[1], [0], [0], [1], [0, 0, 1, 1], [], []>} : vector<1x32xf32>, vector<32x96xf32>, vector<1x96xf32> -> vector<1x96xf32>
    %126 = arith.addf %125, %11 : vector<1x96xf32>
    %127 = vector.extract_strided_slice %124 {offsets = [0, 0], sizes = [1, 32], strides = [1, 1]} : vector<1x96xf32> to vector<1x32xf32>
    %128 = vector.extract_strided_slice %126 {offsets = [0, 0], sizes = [1, 32], strides = [1, 1]} : vector<1x96xf32> to vector<1x32xf32>
    %129 = arith.addf %127, %128 : vector<1x32xf32>
    %cst_50 = arith.constant 5.000000e-01 : f32
    %130 = vector.broadcast %cst_50 : f32 to vector<1x32xf32>
    %131 = arith.mulf %130, %129 : vector<1x32xf32>
    %132 = math.tanh %131 : vector<1x32xf32>
    %cst_51 = arith.constant 1.000000e+00 : f32
    %133 = vector.broadcast %cst_51 : f32 to vector<1x32xf32>
    %134 = arith.addf %132, %133 : vector<1x32xf32>
    %cst_52 = arith.constant 5.000000e-01 : f32
    %135 = vector.broadcast %cst_52 : f32 to vector<1x32xf32>
    %136 = arith.mulf %135, %134 : vector<1x32xf32>
    %137 = vector.extract_strided_slice %124 {offsets = [0, 32], sizes = [1, 32], strides = [1, 1]} : vector<1x96xf32> to vector<1x32xf32>
    %138 = vector.extract_strided_slice %126 {offsets = [0, 32], sizes = [1, 32], strides = [1, 1]} : vector<1x96xf32> to vector<1x32xf32>
    %139 = arith.addf %137, %138 : vector<1x32xf32>
    %cst_53 = arith.constant 5.000000e-01 : f32
    %140 = vector.broadcast %cst_53 : f32 to vector<1x32xf32>
    %141 = arith.mulf %140, %139 : vector<1x32xf32>
    %142 = math.tanh %141 : vector<1x32xf32>
    %cst_54 = arith.constant 1.000000e+00 : f32
    %143 = vector.broadcast %cst_54 : f32 to vector<1x32xf32>
    %144 = arith.addf %142, %143 : vector<1x32xf32>
    %cst_55 = arith.constant 5.000000e-01 : f32
    %145 = vector.broadcast %cst_55 : f32 to vector<1x32xf32>
    %146 = arith.mulf %145, %144 : vector<1x32xf32>
    %147 = vector.extract_strided_slice %124 {offsets = [0, 64], sizes = [1, 32], strides = [1, 1]} : vector<1x96xf32> to vector<1x32xf32>
    %148 = vector.extract_strided_slice %126 {offsets = [0, 64], sizes = [1, 32], strides = [1, 1]} : vector<1x96xf32> to vector<1x32xf32>
    %149 = arith.mulf %136, %148 : vector<1x32xf32>
    %150 = arith.addf %147, %149 : vector<1x32xf32>
    %151 = math.tanh %150 : vector<1x32xf32>
    %cst_56 = arith.constant 1.000000e+00 : f32
    %152 = vector.broadcast %cst_56 : f32 to vector<1x32xf32>
    %153 = arith.subf %152, %146 : vector<1x32xf32>
    %154 = arith.mulf %153, %151 : vector<1x32xf32>
    %155 = arith.mulf %146, %73 : vector<1x32xf32>
    %156 = arith.addf %154, %155 : vector<1x32xf32>
    %cst_57 = arith.constant dense<0.000000e+00> : vector<1x40xf32>
    %157 = tpu.matmul %156, %7, %cst_57 {dimension_numbers = #tpu.dot_dimension_numbers<[1], [0], [0], [1], [0, 0, 1, 1], [], []>} : vector<1x32xf32>, vector<32x40xf32>, vector<1x40xf32> -> vector<1x40xf32>
    %158 = arith.addf %157, %12 : vector<1x40xf32>
    %cst_58 = arith.constant dense<0xFF800000> : vector<1xf32>
    %159 = vector.multi_reduction <maximumf>, %158, %cst_58 [1] : vector<1x40xf32> to vector<1xf32>
    %160 = vector.shape_cast %159 : vector<1xf32> to vector<1x1xf32>
    %161 = vector.broadcast %160 : vector<1x1xf32> to vector<1x40xf32>
    %162 = arith.subf %158, %161 : vector<1x40xf32>
    %163 = math.exp %162 : vector<1x40xf32>
    %cst_59 = arith.constant dense<0.000000e+00> : vector<1xf32>
    %164 = vector.multi_reduction <add>, %163, %cst_59 [1] : vector<1x40xf32> to vector<1xf32>
    %165 = vector.shape_cast %164 : vector<1xf32> to vector<1x1xf32>
    %166 = math.log %165 : vector<1x1xf32>
    %167 = vector.broadcast %166 : vector<1x1xf32> to vector<1x40xf32>
    %168 = arith.subf %162, %167 : vector<1x40xf32>
    %169 = arith.index_cast %c1_i32 : i32 to index
    %c0_60 = arith.constant 0 : index
    %c0_61 = arith.constant 0 : index
    %170 = vector.load %arg9[%169, %c0_60, %c0_61] : memref<6x1x40xf32, #tpu.memory_space<vmem>>, vector<1x1x40xf32>
    %171 = vector.shape_cast %170 : vector<1x1x40xf32> to vector<1x40xf32>
    %172 = vector.shape_cast %168 : vector<1x40xf32> to vector<1x1x40xf32>
    tpu.vector_store %arg9[%169, %c0_60, %c0_61], %172 {strides = array<i32>} : memref<6x1x40xf32, #tpu.memory_space<vmem>>, vector<1x1x40xf32>,
    %173 = arith.index_cast %c1_i32 : i32 to index
    %c0_62 = arith.constant 0 : index
    %c0_63 = arith.constant 0 : index
    %174 = vector.load %arg10[%173, %c0_62, %c0_63] : memref<6x1x32xf32, #tpu.memory_space<vmem>>, vector<1x1x32xf32>
    %175 = vector.shape_cast %174 : vector<1x1x32xf32> to vector<1x32xf32>
    %176 = vector.shape_cast %156 : vector<1x32xf32> to vector<1x1x32xf32>
    tpu.vector_store %arg10[%173, %c0_62, %c0_63], %176 {strides = array<i32>} : memref<6x1x32xf32, #tpu.memory_space<vmem>>, vector<1x1x32xf32>,
    %177 = arith.index_cast %c1_i32 : i32 to index
    %c0_64 = arith.constant 0 : index
    %c0_65 = arith.constant 0 : index
    %178 = vector.load %arg11[%177, %c0_64, %c0_65] : memref<6x1x8xf32, #tpu.memory_space<vmem>>, vector<1x1x8xf32>
    %179 = vector.shape_cast %178 : vector<1x1x8xf32> to vector<1x8xf32>
    %180 = vector.shape_cast %115 : vector<1x8xf32> to vector<1x1x8xf32>
    tpu.vector_store %arg11[%177, %c0_64, %c0_65], %180 {strides = array<i32>} : memref<6x1x8xf32, #tpu.memory_space<vmem>>, vector<1x1x8xf32>,
    %c2_i32 = arith.constant 2 : i32
    %181 = arith.index_cast %c2_i32 : i32 to index
    %182 = memref.load %arg0[%181] : memref<6xi32, #tpu.memory_space<smem>>
    %183 = vector.broadcast %182 : i32 to vector<1x40xi32>
    %184 = arith.cmpi eq, %13, %183 : vector<1x40xi32>
    %185 = arith.extui %184 : vector<1x40xi1> to vector<1x40xi32>
    %186 = arith.sitofp %185 : vector<1x40xi32> to vector<1x40xf32>
    %cst_66 = arith.constant dense<0.000000e+00> : vector<1x32xf32>
    %187 = tpu.matmul %186, %0, %cst_66 {dimension_numbers = #tpu.dot_dimension_numbers<[1], [0], [0], [1], [0, 0, 1, 1], [], []>} : vector<1x40xf32>, vector<40x32xf32>, vector<1x32xf32> -> vector<1x32xf32>
    %cst_67 = arith.constant dense<0.000000e+00> : vector<1x8xf32>
    %188 = tpu.matmul %156, %1, %cst_67 {dimension_numbers = #tpu.dot_dimension_numbers<[1], [1], [0], [0], [0, 0, 1, 0], [], []>} : vector<1x32xf32>, vector<8x32xf32>, vector<1x8xf32> -> vector<1x8xf32>
    %cst_68 = arith.constant dense<0xFF800000> : vector<1xf32>
    %189 = vector.multi_reduction <maximumf>, %188, %cst_68 [1] : vector<1x8xf32> to vector<1xf32>
    %190 = vector.shape_cast %189 : vector<1xf32> to vector<1x1xf32>
    %191 = vector.broadcast %190 : vector<1x1xf32> to vector<1x8xf32>
    %192 = arith.subf %188, %191 : vector<1x8xf32>
    %193 = math.exp %192 : vector<1x8xf32>
    %cst_69 = arith.constant dense<0.000000e+00> : vector<1xf32>
    %194 = vector.multi_reduction <add>, %193, %cst_69 [1] : vector<1x8xf32> to vector<1xf32>
    %195 = vector.shape_cast %194 : vector<1xf32> to vector<1x1xf32>
    %196 = tpu.reciprocal %195 : vector<1x1xf32> -> vector<1x1xf32>
    %197 = vector.broadcast %196 : vector<1x1xf32> to vector<1x8xf32>
    %198 = arith.mulf %193, %197 : vector<1x8xf32>
    %cst_70 = arith.constant dense<0.000000e+00> : vector<1x32xf32>
    %199 = tpu.matmul %198, %1, %cst_70 {dimension_numbers = #tpu.dot_dimension_numbers<[1], [0], [0], [1], [0, 0, 1, 1], [], []>} : vector<1x8xf32>, vector<8x32xf32>, vector<1x32xf32> -> vector<1x32xf32>
    %cst_71 = arith.constant dense<0.000000e+00> : vector<1x32xf32>
    %200 = tpu.matmul %187, %3, %cst_71 {dimension_numbers = #tpu.dot_dimension_numbers<[1], [0], [0], [1], [0, 0, 1, 1], [], []>} : vector<1x32xf32>, vector<32x32xf32>, vector<1x32xf32> -> vector<1x32xf32>
    %cst_72 = arith.constant dense<0.000000e+00> : vector<1x32xf32>
    %201 = tpu.matmul %199, %4, %cst_72 {dimension_numbers = #tpu.dot_dimension_numbers<[1], [0], [0], [1], [0, 0, 1, 1], [], []>} : vector<1x32xf32>, vector<32x32xf32>, vector<1x32xf32> -> vector<1x32xf32>
    %202 = arith.addf %200, %201 : vector<1x32xf32>
    %203 = arith.addf %202, %9 : vector<1x32xf32>
    %cst_73 = arith.constant 0.000000e+00 : f32
    %204 = vector.broadcast %cst_73 : f32 to vector<1x32xf32>
    %205 = arith.maximumf %203, %204 : vector<1x32xf32>
    %cst_74 = arith.constant dense<0.000000e+00> : vector<1x96xf32>
    %206 = tpu.matmul %205, %5, %cst_74 {dimension_numbers = #tpu.dot_dimension_numbers<[1], [0], [0], [1], [0, 0, 1, 1], [], []>} : vector<1x32xf32>, vector<32x96xf32>, vector<1x96xf32> -> vector<1x96xf32>
    %207 = arith.addf %206, %10 : vector<1x96xf32>
    %cst_75 = arith.constant dense<0.000000e+00> : vector<1x96xf32>
    %208 = tpu.matmul %156, %6, %cst_75 {dimension_numbers = #tpu.dot_dimension_numbers<[1], [0], [0], [1], [0, 0, 1, 1], [], []>} : vector<1x32xf32>, vector<32x96xf32>, vector<1x96xf32> -> vector<1x96xf32>
    %209 = arith.addf %208, %11 : vector<1x96xf32>
    %210 = vector.extract_strided_slice %207 {offsets = [0, 0], sizes = [1, 32], strides = [1, 1]} : vector<1x96xf32> to vector<1x32xf32>
    %211 = vector.extract_strided_slice %209 {offsets = [0, 0], sizes = [1, 32], strides = [1, 1]} : vector<1x96xf32> to vector<1x32xf32>
    %212 = arith.addf %210, %211 : vector<1x32xf32>
    %cst_76 = arith.constant 5.000000e-01 : f32
    %213 = vector.broadcast %cst_76 : f32 to vector<1x32xf32>
    %214 = arith.mulf %213, %212 : vector<1x32xf32>
    %215 = math.tanh %214 : vector<1x32xf32>
    %cst_77 = arith.constant 1.000000e+00 : f32
    %216 = vector.broadcast %cst_77 : f32 to vector<1x32xf32>
    %217 = arith.addf %215, %216 : vector<1x32xf32>
    %cst_78 = arith.constant 5.000000e-01 : f32
    %218 = vector.broadcast %cst_78 : f32 to vector<1x32xf32>
    %219 = arith.mulf %218, %217 : vector<1x32xf32>
    %220 = vector.extract_strided_slice %207 {offsets = [0, 32], sizes = [1, 32], strides = [1, 1]} : vector<1x96xf32> to vector<1x32xf32>
    %221 = vector.extract_strided_slice %209 {offsets = [0, 32], sizes = [1, 32], strides = [1, 1]} : vector<1x96xf32> to vector<1x32xf32>
    %222 = arith.addf %220, %221 : vector<1x32xf32>
    %cst_79 = arith.constant 5.000000e-01 : f32
    %223 = vector.broadcast %cst_79 : f32 to vector<1x32xf32>
    %224 = arith.mulf %223, %222 : vector<1x32xf32>
    %225 = math.tanh %224 : vector<1x32xf32>
    %cst_80 = arith.constant 1.000000e+00 : f32
    %226 = vector.broadcast %cst_80 : f32 to vector<1x32xf32>
    %227 = arith.addf %225, %226 : vector<1x32xf32>
    %cst_81 = arith.constant 5.000000e-01 : f32
    %228 = vector.broadcast %cst_81 : f32 to vector<1x32xf32>
    %229 = arith.mulf %228, %227 : vector<1x32xf32>
    %230 = vector.extract_strided_slice %207 {offsets = [0, 64], sizes = [1, 32], strides = [1, 1]} : vector<1x96xf32> to vector<1x32xf32>
    %231 = vector.extract_strided_slice %209 {offsets = [0, 64], sizes = [1, 32], strides = [1, 1]} : vector<1x96xf32> to vector<1x32xf32>
    %232 = arith.mulf %219, %231 : vector<1x32xf32>
    %233 = arith.addf %230, %232 : vector<1x32xf32>
    %234 = math.tanh %233 : vector<1x32xf32>
    %cst_82 = arith.constant 1.000000e+00 : f32
    %235 = vector.broadcast %cst_82 : f32 to vector<1x32xf32>
    %236 = arith.subf %235, %229 : vector<1x32xf32>
    %237 = arith.mulf %236, %234 : vector<1x32xf32>
    %238 = arith.mulf %229, %156 : vector<1x32xf32>
    %239 = arith.addf %237, %238 : vector<1x32xf32>
    %cst_83 = arith.constant dense<0.000000e+00> : vector<1x40xf32>
    %240 = tpu.matmul %239, %7, %cst_83 {dimension_numbers = #tpu.dot_dimension_numbers<[1], [0], [0], [1], [0, 0, 1, 1], [], []>} : vector<1x32xf32>, vector<32x40xf32>, vector<1x40xf32> -> vector<1x40xf32>
    %241 = arith.addf %240, %12 : vector<1x40xf32>
    %cst_84 = arith.constant dense<0xFF800000> : vector<1xf32>
    %242 = vector.multi_reduction <maximumf>, %241, %cst_84 [1] : vector<1x40xf32> to vector<1xf32>
    %243 = vector.shape_cast %242 : vector<1xf32> to vector<1x1xf32>
    %244 = vector.broadcast %243 : vector<1x1xf32> to vector<1x40xf32>
    %245 = arith.subf %241, %244 : vector<1x40xf32>
    %246 = math.exp %245 : vector<1x40xf32>
    %cst_85 = arith.constant dense<0.000000e+00> : vector<1xf32>
    %247 = vector.multi_reduction <add>, %246, %cst_85 [1] : vector<1x40xf32> to vector<1xf32>
    %248 = vector.shape_cast %247 : vector<1xf32> to vector<1x1xf32>
    %249 = math.log %248 : vector<1x1xf32>
    %250 = vector.broadcast %249 : vector<1x1xf32> to vector<1x40xf32>
    %251 = arith.subf %245, %250 : vector<1x40xf32>
    %252 = arith.index_cast %c2_i32 : i32 to index
    %c0_86 = arith.constant 0 : index
    %c0_87 = arith.constant 0 : index
    %253 = vector.load %arg9[%252, %c0_86, %c0_87] : memref<6x1x40xf32, #tpu.memory_space<vmem>>, vector<1x1x40xf32>
    %254 = vector.shape_cast %253 : vector<1x1x40xf32> to vector<1x40xf32>
    %255 = vector.shape_cast %251 : vector<1x40xf32> to vector<1x1x40xf32>
    tpu.vector_store %arg9[%252, %c0_86, %c0_87], %255 {strides = array<i32>} : memref<6x1x40xf32, #tpu.memory_space<vmem>>, vector<1x1x40xf32>,
    %256 = arith.index_cast %c2_i32 : i32 to index
    %c0_88 = arith.constant 0 : index
    %c0_89 = arith.constant 0 : index
    %257 = vector.load %arg10[%256, %c0_88, %c0_89] : memref<6x1x32xf32, #tpu.memory_space<vmem>>, vector<1x1x32xf32>
    %258 = vector.shape_cast %257 : vector<1x1x32xf32> to vector<1x32xf32>
    %259 = vector.shape_cast %239 : vector<1x32xf32> to vector<1x1x32xf32>
    tpu.vector_store %arg10[%256, %c0_88, %c0_89], %259 {strides = array<i32>} : memref<6x1x32xf32, #tpu.memory_space<vmem>>, vector<1x1x32xf32>,
    %260 = arith.index_cast %c2_i32 : i32 to index
    %c0_90 = arith.constant 0 : index
    %c0_91 = arith.constant 0 : index
    %261 = vector.load %arg11[%260, %c0_90, %c0_91] : memref<6x1x8xf32, #tpu.memory_space<vmem>>, vector<1x1x8xf32>
    %262 = vector.shape_cast %261 : vector<1x1x8xf32> to vector<1x8xf32>
    %263 = vector.shape_cast %198 : vector<1x8xf32> to vector<1x1x8xf32>
    tpu.vector_store %arg11[%260, %c0_90, %c0_91], %263 {strides = array<i32>} : memref<6x1x8xf32, #tpu.memory_space<vmem>>, vector<1x1x8xf32>,
    %c3_i32 = arith.constant 3 : i32
    %264 = arith.index_cast %c3_i32 : i32 to index
    %265 = memref.load %arg0[%264] : memref<6xi32, #tpu.memory_space<smem>>
    %266 = vector.broadcast %265 : i32 to vector<1x40xi32>
    %267 = arith.cmpi eq, %13, %266 : vector<1x40xi32>
    %268 = arith.extui %267 : vector<1x40xi1> to vector<1x40xi32>
    %269 = arith.sitofp %268 : vector<1x40xi32> to vector<1x40xf32>
    %cst_92 = arith.constant dense<0.000000e+00> : vector<1x32xf32>
    %270 = tpu.matmul %269, %0, %cst_92 {dimension_numbers = #tpu.dot_dimension_numbers<[1], [0], [0], [1], [0, 0, 1, 1], [], []>} : vector<1x40xf32>, vector<40x32xf32>, vector<1x32xf32> -> vector<1x32xf32>
    %cst_93 = arith.constant dense<0.000000e+00> : vector<1x8xf32>
    %271 = tpu.matmul %239, %1, %cst_93 {dimension_numbers = #tpu.dot_dimension_numbers<[1], [1], [0], [0], [0, 0, 1, 0], [], []>} : vector<1x32xf32>, vector<8x32xf32>, vector<1x8xf32> -> vector<1x8xf32>
    %cst_94 = arith.constant dense<0xFF800000> : vector<1xf32>
    %272 = vector.multi_reduction <maximumf>, %271, %cst_94 [1] : vector<1x8xf32> to vector<1xf32>
    %273 = vector.shape_cast %272 : vector<1xf32> to vector<1x1xf32>
    %274 = vector.broadcast %273 : vector<1x1xf32> to vector<1x8xf32>
    %275 = arith.subf %271, %274 : vector<1x8xf32>
    %276 = math.exp %275 : vector<1x8xf32>
    %cst_95 = arith.constant dense<0.000000e+00> : vector<1xf32>
    %277 = vector.multi_reduction <add>, %276, %cst_95 [1] : vector<1x8xf32> to vector<1xf32>
    %278 = vector.shape_cast %277 : vector<1xf32> to vector<1x1xf32>
    %279 = tpu.reciprocal %278 : vector<1x1xf32> -> vector<1x1xf32>
    %280 = vector.broadcast %279 : vector<1x1xf32> to vector<1x8xf32>
    %281 = arith.mulf %276, %280 : vector<1x8xf32>
    %cst_96 = arith.constant dense<0.000000e+00> : vector<1x32xf32>
    %282 = tpu.matmul %281, %1, %cst_96 {dimension_numbers = #tpu.dot_dimension_numbers<[1], [0], [0], [1], [0, 0, 1, 1], [], []>} : vector<1x8xf32>, vector<8x32xf32>, vector<1x32xf32> -> vector<1x32xf32>
    %cst_97 = arith.constant dense<0.000000e+00> : vector<1x32xf32>
    %283 = tpu.matmul %270, %3, %cst_97 {dimension_numbers = #tpu.dot_dimension_numbers<[1], [0], [0], [1], [0, 0, 1, 1], [], []>} : vector<1x32xf32>, vector<32x32xf32>, vector<1x32xf32> -> vector<1x32xf32>
    %cst_98 = arith.constant dense<0.000000e+00> : vector<1x32xf32>
    %284 = tpu.matmul %282, %4, %cst_98 {dimension_numbers = #tpu.dot_dimension_numbers<[1], [0], [0], [1], [0, 0, 1, 1], [], []>} : vector<1x32xf32>, vector<32x32xf32>, vector<1x32xf32> -> vector<1x32xf32>
    %285 = arith.addf %283, %284 : vector<1x32xf32>
    %286 = arith.addf %285, %9 : vector<1x32xf32>
    %cst_99 = arith.constant 0.000000e+00 : f32
    %287 = vector.broadcast %cst_99 : f32 to vector<1x32xf32>
    %288 = arith.maximumf %286, %287 : vector<1x32xf32>
    %cst_100 = arith.constant dense<0.000000e+00> : vector<1x96xf32>
    %289 = tpu.matmul %288, %5, %cst_100 {dimension_numbers = #tpu.dot_dimension_numbers<[1], [0], [0], [1], [0, 0, 1, 1], [], []>} : vector<1x32xf32>, vector<32x96xf32>, vector<1x96xf32> -> vector<1x96xf32>
    %290 = arith.addf %289, %10 : vector<1x96xf32>
    %cst_101 = arith.constant dense<0.000000e+00> : vector<1x96xf32>
    %291 = tpu.matmul %239, %6, %cst_101 {dimension_numbers = #tpu.dot_dimension_numbers<[1], [0], [0], [1], [0, 0, 1, 1], [], []>} : vector<1x32xf32>, vector<32x96xf32>, vector<1x96xf32> -> vector<1x96xf32>
    %292 = arith.addf %291, %11 : vector<1x96xf32>
    %293 = vector.extract_strided_slice %290 {offsets = [0, 0], sizes = [1, 32], strides = [1, 1]} : vector<1x96xf32> to vector<1x32xf32>
    %294 = vector.extract_strided_slice %292 {offsets = [0, 0], sizes = [1, 32], strides = [1, 1]} : vector<1x96xf32> to vector<1x32xf32>
    %295 = arith.addf %293, %294 : vector<1x32xf32>
    %cst_102 = arith.constant 5.000000e-01 : f32
    %296 = vector.broadcast %cst_102 : f32 to vector<1x32xf32>
    %297 = arith.mulf %296, %295 : vector<1x32xf32>
    %298 = math.tanh %297 : vector<1x32xf32>
    %cst_103 = arith.constant 1.000000e+00 : f32
    %299 = vector.broadcast %cst_103 : f32 to vector<1x32xf32>
    %300 = arith.addf %298, %299 : vector<1x32xf32>
    %cst_104 = arith.constant 5.000000e-01 : f32
    %301 = vector.broadcast %cst_104 : f32 to vector<1x32xf32>
    %302 = arith.mulf %301, %300 : vector<1x32xf32>
    %303 = vector.extract_strided_slice %290 {offsets = [0, 32], sizes = [1, 32], strides = [1, 1]} : vector<1x96xf32> to vector<1x32xf32>
    %304 = vector.extract_strided_slice %292 {offsets = [0, 32], sizes = [1, 32], strides = [1, 1]} : vector<1x96xf32> to vector<1x32xf32>
    %305 = arith.addf %303, %304 : vector<1x32xf32>
    %cst_105 = arith.constant 5.000000e-01 : f32
    %306 = vector.broadcast %cst_105 : f32 to vector<1x32xf32>
    %307 = arith.mulf %306, %305 : vector<1x32xf32>
    %308 = math.tanh %307 : vector<1x32xf32>
    %cst_106 = arith.constant 1.000000e+00 : f32
    %309 = vector.broadcast %cst_106 : f32 to vector<1x32xf32>
    %310 = arith.addf %308, %309 : vector<1x32xf32>
    %cst_107 = arith.constant 5.000000e-01 : f32
    %311 = vector.broadcast %cst_107 : f32 to vector<1x32xf32>
    %312 = arith.mulf %311, %310 : vector<1x32xf32>
    %313 = vector.extract_strided_slice %290 {offsets = [0, 64], sizes = [1, 32], strides = [1, 1]} : vector<1x96xf32> to vector<1x32xf32>
    %314 = vector.extract_strided_slice %292 {offsets = [0, 64], sizes = [1, 32], strides = [1, 1]} : vector<1x96xf32> to vector<1x32xf32>
    %315 = arith.mulf %302, %314 : vector<1x32xf32>
    %316 = arith.addf %313, %315 : vector<1x32xf32>
    %317 = math.tanh %316 : vector<1x32xf32>
    %cst_108 = arith.constant 1.000000e+00 : f32
    %318 = vector.broadcast %cst_108 : f32 to vector<1x32xf32>
    %319 = arith.subf %318, %312 : vector<1x32xf32>
    %320 = arith.mulf %319, %317 : vector<1x32xf32>
    %321 = arith.mulf %312, %239 : vector<1x32xf32>
    %322 = arith.addf %320, %321 : vector<1x32xf32>
    %cst_109 = arith.constant dense<0.000000e+00> : vector<1x40xf32>
    %323 = tpu.matmul %322, %7, %cst_109 {dimension_numbers = #tpu.dot_dimension_numbers<[1], [0], [0], [1], [0, 0, 1, 1], [], []>} : vector<1x32xf32>, vector<32x40xf32>, vector<1x40xf32> -> vector<1x40xf32>
    %324 = arith.addf %323, %12 : vector<1x40xf32>
    %cst_110 = arith.constant dense<0xFF800000> : vector<1xf32>
    %325 = vector.multi_reduction <maximumf>, %324, %cst_110 [1] : vector<1x40xf32> to vector<1xf32>
    %326 = vector.shape_cast %325 : vector<1xf32> to vector<1x1xf32>
    %327 = vector.broadcast %326 : vector<1x1xf32> to vector<1x40xf32>
    %328 = arith.subf %324, %327 : vector<1x40xf32>
    %329 = math.exp %328 : vector<1x40xf32>
    %cst_111 = arith.constant dense<0.000000e+00> : vector<1xf32>
    %330 = vector.multi_reduction <add>, %329, %cst_111 [1] : vector<1x40xf32> to vector<1xf32>
    %331 = vector.shape_cast %330 : vector<1xf32> to vector<1x1xf32>
    %332 = math.log %331 : vector<1x1xf32>
    %333 = vector.broadcast %332 : vector<1x1xf32> to vector<1x40xf32>
    %334 = arith.subf %328, %333 : vector<1x40xf32>
    %335 = arith.index_cast %c3_i32 : i32 to index
    %c0_112 = arith.constant 0 : index
    %c0_113 = arith.constant 0 : index
    %336 = vector.load %arg9[%335, %c0_112, %c0_113] : memref<6x1x40xf32, #tpu.memory_space<vmem>>, vector<1x1x40xf32>
    %337 = vector.shape_cast %336 : vector<1x1x40xf32> to vector<1x40xf32>
    %338 = vector.shape_cast %334 : vector<1x40xf32> to vector<1x1x40xf32>
    tpu.vector_store %arg9[%335, %c0_112, %c0_113], %338 {strides = array<i32>} : memref<6x1x40xf32, #tpu.memory_space<vmem>>, vector<1x1x40xf32>,
    %339 = arith.index_cast %c3_i32 : i32 to index
    %c0_114 = arith.constant 0 : index
    %c0_115 = arith.constant 0 : index
    %340 = vector.load %arg10[%339, %c0_114, %c0_115] : memref<6x1x32xf32, #tpu.memory_space<vmem>>, vector<1x1x32xf32>
    %341 = vector.shape_cast %340 : vector<1x1x32xf32> to vector<1x32xf32>
    %342 = vector.shape_cast %322 : vector<1x32xf32> to vector<1x1x32xf32>
    tpu.vector_store %arg10[%339, %c0_114, %c0_115], %342 {strides = array<i32>} : memref<6x1x32xf32, #tpu.memory_space<vmem>>, vector<1x1x32xf32>,
    %343 = arith.index_cast %c3_i32 : i32 to index
    %c0_116 = arith.constant 0 : index
    %c0_117 = arith.constant 0 : index
    %344 = vector.load %arg11[%343, %c0_116, %c0_117] : memref<6x1x8xf32, #tpu.memory_space<vmem>>, vector<1x1x8xf32>
    %345 = vector.shape_cast %344 : vector<1x1x8xf32> to vector<1x8xf32>
    %346 = vector.shape_cast %281 : vector<1x8xf32> to vector<1x1x8xf32>
    tpu.vector_store %arg11[%343, %c0_116, %c0_117], %346 {strides = array<i32>} : memref<6x1x8xf32, #tpu.memory_space<vmem>>, vector<1x1x8xf32>,
    %c4_i32 = arith.constant 4 : i32
    %347 = arith.index_cast %c4_i32 : i32 to index
    %348 = memref.load %arg0[%347] : memref<6xi32, #tpu.memory_space<smem>>
    %349 = vector.broadcast %348 : i32 to vector<1x40xi32>
    %350 = arith.cmpi eq, %13, %349 : vector<1x40xi32>
    %351 = arith.extui %350 : vector<1x40xi1> to vector<1x40xi32>
    %352 = arith.sitofp %351 : vector<1x40xi32> to vector<1x40xf32>
    %cst_118 = arith.constant dense<0.000000e+00> : vector<1x32xf32>
    %353 = tpu.matmul %352, %0, %cst_118 {dimension_numbers = #tpu.dot_dimension_numbers<[1], [0], [0], [1], [0, 0, 1, 1], [], []>} : vector<1x40xf32>, vector<40x32xf32>, vector<1x32xf32> -> vector<1x32xf32>
    %cst_119 = arith.constant dense<0.000000e+00> : vector<1x8xf32>
    %354 = tpu.matmul %322, %1, %cst_119 {dimension_numbers = #tpu.dot_dimension_numbers<[1], [1], [0], [0], [0, 0, 1, 0], [], []>} : vector<1x32xf32>, vector<8x32xf32>, vector<1x8xf32> -> vector<1x8xf32>
    %cst_120 = arith.constant dense<0xFF800000> : vector<1xf32>
    %355 = vector.multi_reduction <maximumf>, %354, %cst_120 [1] : vector<1x8xf32> to vector<1xf32>
    %356 = vector.shape_cast %355 : vector<1xf32> to vector<1x1xf32>
    %357 = vector.broadcast %356 : vector<1x1xf32> to vector<1x8xf32>
    %358 = arith.subf %354, %357 : vector<1x8xf32>
    %359 = math.exp %358 : vector<1x8xf32>
    %cst_121 = arith.constant dense<0.000000e+00> : vector<1xf32>
    %360 = vector.multi_reduction <add>, %359, %cst_121 [1] : vector<1x8xf32> to vector<1xf32>
    %361 = vector.shape_cast %360 : vector<1xf32> to vector<1x1xf32>
    %362 = tpu.reciprocal %361 : vector<1x1xf32> -> vector<1x1xf32>
    %363 = vector.broadcast %362 : vector<1x1xf32> to vector<1x8xf32>
    %364 = arith.mulf %359, %363 : vector<1x8xf32>
    %cst_122 = arith.constant dense<0.000000e+00> : vector<1x32xf32>
    %365 = tpu.matmul %364, %1, %cst_122 {dimension_numbers = #tpu.dot_dimension_numbers<[1], [0], [0], [1], [0, 0, 1, 1], [], []>} : vector<1x8xf32>, vector<8x32xf32>, vector<1x32xf32> -> vector<1x32xf32>
    %cst_123 = arith.constant dense<0.000000e+00> : vector<1x32xf32>
    %366 = tpu.matmul %353, %3, %cst_123 {dimension_numbers = #tpu.dot_dimension_numbers<[1], [0], [0], [1], [0, 0, 1, 1], [], []>} : vector<1x32xf32>, vector<32x32xf32>, vector<1x32xf32> -> vector<1x32xf32>
    %cst_124 = arith.constant dense<0.000000e+00> : vector<1x32xf32>
    %367 = tpu.matmul %365, %4, %cst_124 {dimension_numbers = #tpu.dot_dimension_numbers<[1], [0], [0], [1], [0, 0, 1, 1], [], []>} : vector<1x32xf32>, vector<32x32xf32>, vector<1x32xf32> -> vector<1x32xf32>
    %368 = arith.addf %366, %367 : vector<1x32xf32>
    %369 = arith.addf %368, %9 : vector<1x32xf32>
    %cst_125 = arith.constant 0.000000e+00 : f32
    %370 = vector.broadcast %cst_125 : f32 to vector<1x32xf32>
    %371 = arith.maximumf %369, %370 : vector<1x32xf32>
    %cst_126 = arith.constant dense<0.000000e+00> : vector<1x96xf32>
    %372 = tpu.matmul %371, %5, %cst_126 {dimension_numbers = #tpu.dot_dimension_numbers<[1], [0], [0], [1], [0, 0, 1, 1], [], []>} : vector<1x32xf32>, vector<32x96xf32>, vector<1x96xf32> -> vector<1x96xf32>
    %373 = arith.addf %372, %10 : vector<1x96xf32>
    %cst_127 = arith.constant dense<0.000000e+00> : vector<1x96xf32>
    %374 = tpu.matmul %322, %6, %cst_127 {dimension_numbers = #tpu.dot_dimension_numbers<[1], [0], [0], [1], [0, 0, 1, 1], [], []>} : vector<1x32xf32>, vector<32x96xf32>, vector<1x96xf32> -> vector<1x96xf32>
    %375 = arith.addf %374, %11 : vector<1x96xf32>
    %376 = vector.extract_strided_slice %373 {offsets = [0, 0], sizes = [1, 32], strides = [1, 1]} : vector<1x96xf32> to vector<1x32xf32>
    %377 = vector.extract_strided_slice %375 {offsets = [0, 0], sizes = [1, 32], strides = [1, 1]} : vector<1x96xf32> to vector<1x32xf32>
    %378 = arith.addf %376, %377 : vector<1x32xf32>
    %cst_128 = arith.constant 5.000000e-01 : f32
    %379 = vector.broadcast %cst_128 : f32 to vector<1x32xf32>
    %380 = arith.mulf %379, %378 : vector<1x32xf32>
    %381 = math.tanh %380 : vector<1x32xf32>
    %cst_129 = arith.constant 1.000000e+00 : f32
    %382 = vector.broadcast %cst_129 : f32 to vector<1x32xf32>
    %383 = arith.addf %381, %382 : vector<1x32xf32>
    %cst_130 = arith.constant 5.000000e-01 : f32
    %384 = vector.broadcast %cst_130 : f32 to vector<1x32xf32>
    %385 = arith.mulf %384, %383 : vector<1x32xf32>
    %386 = vector.extract_strided_slice %373 {offsets = [0, 32], sizes = [1, 32], strides = [1, 1]} : vector<1x96xf32> to vector<1x32xf32>
    %387 = vector.extract_strided_slice %375 {offsets = [0, 32], sizes = [1, 32], strides = [1, 1]} : vector<1x96xf32> to vector<1x32xf32>
    %388 = arith.addf %386, %387 : vector<1x32xf32>
    %cst_131 = arith.constant 5.000000e-01 : f32
    %389 = vector.broadcast %cst_131 : f32 to vector<1x32xf32>
    %390 = arith.mulf %389, %388 : vector<1x32xf32>
    %391 = math.tanh %390 : vector<1x32xf32>
    %cst_132 = arith.constant 1.000000e+00 : f32
    %392 = vector.broadcast %cst_132 : f32 to vector<1x32xf32>
    %393 = arith.addf %391, %392 : vector<1x32xf32>
    %cst_133 = arith.constant 5.000000e-01 : f32
    %394 = vector.broadcast %cst_133 : f32 to vector<1x32xf32>
    %395 = arith.mulf %394, %393 : vector<1x32xf32>
    %396 = vector.extract_strided_slice %373 {offsets = [0, 64], sizes = [1, 32], strides = [1, 1]} : vector<1x96xf32> to vector<1x32xf32>
    %397 = vector.extract_strided_slice %375 {offsets = [0, 64], sizes = [1, 32], strides = [1, 1]} : vector<1x96xf32> to vector<1x32xf32>
    %398 = arith.mulf %385, %397 : vector<1x32xf32>
    %399 = arith.addf %396, %398 : vector<1x32xf32>
    %400 = math.tanh %399 : vector<1x32xf32>
    %cst_134 = arith.constant 1.000000e+00 : f32
    %401 = vector.broadcast %cst_134 : f32 to vector<1x32xf32>
    %402 = arith.subf %401, %395 : vector<1x32xf32>
    %403 = arith.mulf %402, %400 : vector<1x32xf32>
    %404 = arith.mulf %395, %322 : vector<1x32xf32>
    %405 = arith.addf %403, %404 : vector<1x32xf32>
    %cst_135 = arith.constant dense<0.000000e+00> : vector<1x40xf32>
    %406 = tpu.matmul %405, %7, %cst_135 {dimension_numbers = #tpu.dot_dimension_numbers<[1], [0], [0], [1], [0, 0, 1, 1], [], []>} : vector<1x32xf32>, vector<32x40xf32>, vector<1x40xf32> -> vector<1x40xf32>
    %407 = arith.addf %406, %12 : vector<1x40xf32>
    %cst_136 = arith.constant dense<0xFF800000> : vector<1xf32>
    %408 = vector.multi_reduction <maximumf>, %407, %cst_136 [1] : vector<1x40xf32> to vector<1xf32>
    %409 = vector.shape_cast %408 : vector<1xf32> to vector<1x1xf32>
    %410 = vector.broadcast %409 : vector<1x1xf32> to vector<1x40xf32>
    %411 = arith.subf %407, %410 : vector<1x40xf32>
    %412 = math.exp %411 : vector<1x40xf32>
    %cst_137 = arith.constant dense<0.000000e+00> : vector<1xf32>
    %413 = vector.multi_reduction <add>, %412, %cst_137 [1] : vector<1x40xf32> to vector<1xf32>
    %414 = vector.shape_cast %413 : vector<1xf32> to vector<1x1xf32>
    %415 = math.log %414 : vector<1x1xf32>
    %416 = vector.broadcast %415 : vector<1x1xf32> to vector<1x40xf32>
    %417 = arith.subf %411, %416 : vector<1x40xf32>
    %418 = arith.index_cast %c4_i32 : i32 to index
    %c0_138 = arith.constant 0 : index
    %c0_139 = arith.constant 0 : index
    %419 = vector.load %arg9[%418, %c0_138, %c0_139] : memref<6x1x40xf32, #tpu.memory_space<vmem>>, vector<1x1x40xf32>
    %420 = vector.shape_cast %419 : vector<1x1x40xf32> to vector<1x40xf32>
    %421 = vector.shape_cast %417 : vector<1x40xf32> to vector<1x1x40xf32>
    tpu.vector_store %arg9[%418, %c0_138, %c0_139], %421 {strides = array<i32>} : memref<6x1x40xf32, #tpu.memory_space<vmem>>, vector<1x1x40xf32>,
    %422 = arith.index_cast %c4_i32 : i32 to index
    %c0_140 = arith.constant 0 : index
    %c0_141 = arith.constant 0 : index
    %423 = vector.load %arg10[%422, %c0_140, %c0_141] : memref<6x1x32xf32, #tpu.memory_space<vmem>>, vector<1x1x32xf32>
    %424 = vector.shape_cast %423 : vector<1x1x32xf32> to vector<1x32xf32>
    %425 = vector.shape_cast %405 : vector<1x32xf32> to vector<1x1x32xf32>
    tpu.vector_store %arg10[%422, %c0_140, %c0_141], %425 {strides = array<i32>} : memref<6x1x32xf32, #tpu.memory_space<vmem>>, vector<1x1x32xf32>,
    %426 = arith.index_cast %c4_i32 : i32 to index
    %c0_142 = arith.constant 0 : index
    %c0_143 = arith.constant 0 : index
    %427 = vector.load %arg11[%426, %c0_142, %c0_143] : memref<6x1x8xf32, #tpu.memory_space<vmem>>, vector<1x1x8xf32>
    %428 = vector.shape_cast %427 : vector<1x1x8xf32> to vector<1x8xf32>
    %429 = vector.shape_cast %364 : vector<1x8xf32> to vector<1x1x8xf32>
    tpu.vector_store %arg11[%426, %c0_142, %c0_143], %429 {strides = array<i32>} : memref<6x1x8xf32, #tpu.memory_space<vmem>>, vector<1x1x8xf32>,
    %c5_i32 = arith.constant 5 : i32
    %430 = arith.index_cast %c5_i32 : i32 to index
    %431 = memref.load %arg0[%430] : memref<6xi32, #tpu.memory_space<smem>>
    %432 = vector.broadcast %431 : i32 to vector<1x40xi32>
    %433 = arith.cmpi eq, %13, %432 : vector<1x40xi32>
    %434 = arith.extui %433 : vector<1x40xi1> to vector<1x40xi32>
    %435 = arith.sitofp %434 : vector<1x40xi32> to vector<1x40xf32>
    %cst_144 = arith.constant dense<0.000000e+00> : vector<1x32xf32>
    %436 = tpu.matmul %435, %0, %cst_144 {dimension_numbers = #tpu.dot_dimension_numbers<[1], [0], [0], [1], [0, 0, 1, 1], [], []>} : vector<1x40xf32>, vector<40x32xf32>, vector<1x32xf32> -> vector<1x32xf32>
    %cst_145 = arith.constant dense<0.000000e+00> : vector<1x8xf32>
    %437 = tpu.matmul %405, %1, %cst_145 {dimension_numbers = #tpu.dot_dimension_numbers<[1], [1], [0], [0], [0, 0, 1, 0], [], []>} : vector<1x32xf32>, vector<8x32xf32>, vector<1x8xf32> -> vector<1x8xf32>
    %cst_146 = arith.constant dense<0xFF800000> : vector<1xf32>
    %438 = vector.multi_reduction <maximumf>, %437, %cst_146 [1] : vector<1x8xf32> to vector<1xf32>
    %439 = vector.shape_cast %438 : vector<1xf32> to vector<1x1xf32>
    %440 = vector.broadcast %439 : vector<1x1xf32> to vector<1x8xf32>
    %441 = arith.subf %437, %440 : vector<1x8xf32>
    %442 = math.exp %441 : vector<1x8xf32>
    %cst_147 = arith.constant dense<0.000000e+00> : vector<1xf32>
    %443 = vector.multi_reduction <add>, %442, %cst_147 [1] : vector<1x8xf32> to vector<1xf32>
    %444 = vector.shape_cast %443 : vector<1xf32> to vector<1x1xf32>
    %445 = tpu.reciprocal %444 : vector<1x1xf32> -> vector<1x1xf32>
    %446 = vector.broadcast %445 : vector<1x1xf32> to vector<1x8xf32>
    %447 = arith.mulf %442, %446 : vector<1x8xf32>
    %cst_148 = arith.constant dense<0.000000e+00> : vector<1x32xf32>
    %448 = tpu.matmul %447, %1, %cst_148 {dimension_numbers = #tpu.dot_dimension_numbers<[1], [0], [0], [1], [0, 0, 1, 1], [], []>} : vector<1x8xf32>, vector<8x32xf32>, vector<1x32xf32> -> vector<1x32xf32>
    %cst_149 = arith.constant dense<0.000000e+00> : vector<1x32xf32>
    %449 = tpu.matmul %436, %3, %cst_149 {dimension_numbers = #tpu.dot_dimension_numbers<[1], [0], [0], [1], [0, 0, 1, 1], [], []>} : vector<1x32xf32>, vector<32x32xf32>, vector<1x32xf32> -> vector<1x32xf32>
    %cst_150 = arith.constant dense<0.000000e+00> : vector<1x32xf32>
    %450 = tpu.matmul %448, %4, %cst_150 {dimension_numbers = #tpu.dot_dimension_numbers<[1], [0], [0], [1], [0, 0, 1, 1], [], []>} : vector<1x32xf32>, vector<32x32xf32>, vector<1x32xf32> -> vector<1x32xf32>
    %451 = arith.addf %449, %450 : vector<1x32xf32>
    %452 = arith.addf %451, %9 : vector<1x32xf32>
    %cst_151 = arith.constant 0.000000e+00 : f32
    %453 = vector.broadcast %cst_151 : f32 to vector<1x32xf32>
    %454 = arith.maximumf %452, %453 : vector<1x32xf32>
    %cst_152 = arith.constant dense<0.000000e+00> : vector<1x96xf32>
    %455 = tpu.matmul %454, %5, %cst_152 {dimension_numbers = #tpu.dot_dimension_numbers<[1], [0], [0], [1], [0, 0, 1, 1], [], []>} : vector<1x32xf32>, vector<32x96xf32>, vector<1x96xf32> -> vector<1x96xf32>
    %456 = arith.addf %455, %10 : vector<1x96xf32>
    %cst_153 = arith.constant dense<0.000000e+00> : vector<1x96xf32>
    %457 = tpu.matmul %405, %6, %cst_153 {dimension_numbers = #tpu.dot_dimension_numbers<[1], [0], [0], [1], [0, 0, 1, 1], [], []>} : vector<1x32xf32>, vector<32x96xf32>, vector<1x96xf32> -> vector<1x96xf32>
    %458 = arith.addf %457, %11 : vector<1x96xf32>
    %459 = vector.extract_strided_slice %456 {offsets = [0, 0], sizes = [1, 32], strides = [1, 1]} : vector<1x96xf32> to vector<1x32xf32>
    %460 = vector.extract_strided_slice %458 {offsets = [0, 0], sizes = [1, 32], strides = [1, 1]} : vector<1x96xf32> to vector<1x32xf32>
    %461 = arith.addf %459, %460 : vector<1x32xf32>
    %cst_154 = arith.constant 5.000000e-01 : f32
    %462 = vector.broadcast %cst_154 : f32 to vector<1x32xf32>
    %463 = arith.mulf %462, %461 : vector<1x32xf32>
    %464 = math.tanh %463 : vector<1x32xf32>
    %cst_155 = arith.constant 1.000000e+00 : f32
    %465 = vector.broadcast %cst_155 : f32 to vector<1x32xf32>
    %466 = arith.addf %464, %465 : vector<1x32xf32>
    %cst_156 = arith.constant 5.000000e-01 : f32
    %467 = vector.broadcast %cst_156 : f32 to vector<1x32xf32>
    %468 = arith.mulf %467, %466 : vector<1x32xf32>
    %469 = vector.extract_strided_slice %456 {offsets = [0, 32], sizes = [1, 32], strides = [1, 1]} : vector<1x96xf32> to vector<1x32xf32>
    %470 = vector.extract_strided_slice %458 {offsets = [0, 32], sizes = [1, 32], strides = [1, 1]} : vector<1x96xf32> to vector<1x32xf32>
    %471 = arith.addf %469, %470 : vector<1x32xf32>
    %cst_157 = arith.constant 5.000000e-01 : f32
    %472 = vector.broadcast %cst_157 : f32 to vector<1x32xf32>
    %473 = arith.mulf %472, %471 : vector<1x32xf32>
    %474 = math.tanh %473 : vector<1x32xf32>
    %cst_158 = arith.constant 1.000000e+00 : f32
    %475 = vector.broadcast %cst_158 : f32 to vector<1x32xf32>
    %476 = arith.addf %474, %475 : vector<1x32xf32>
    %cst_159 = arith.constant 5.000000e-01 : f32
    %477 = vector.broadcast %cst_159 : f32 to vector<1x32xf32>
    %478 = arith.mulf %477, %476 : vector<1x32xf32>
    %479 = vector.extract_strided_slice %456 {offsets = [0, 64], sizes = [1, 32], strides = [1, 1]} : vector<1x96xf32> to vector<1x32xf32>
    %480 = vector.extract_strided_slice %458 {offsets = [0, 64], sizes = [1, 32], strides = [1, 1]} : vector<1x96xf32> to vector<1x32xf32>
    %481 = arith.mulf %468, %480 : vector<1x32xf32>
    %482 = arith.addf %479, %481 : vector<1x32xf32>
    %483 = math.tanh %482 : vector<1x32xf32>
    %cst_160 = arith.constant 1.000000e+00 : f32
    %484 = vector.broadcast %cst_160 : f32 to vector<1x32xf32>
    %485 = arith.subf %484, %478 : vector<1x32xf32>
    %486 = arith.mulf %485, %483 : vector<1x32xf32>
    %487 = arith.mulf %478, %405 : vector<1x32xf32>
    %488 = arith.addf %486, %487 : vector<1x32xf32>
    %cst_161 = arith.constant dense<0.000000e+00> : vector<1x40xf32>
    %489 = tpu.matmul %488, %7, %cst_161 {dimension_numbers = #tpu.dot_dimension_numbers<[1], [0], [0], [1], [0, 0, 1, 1], [], []>} : vector<1x32xf32>, vector<32x40xf32>, vector<1x40xf32> -> vector<1x40xf32>
    %490 = arith.addf %489, %12 : vector<1x40xf32>
    %cst_162 = arith.constant dense<0xFF800000> : vector<1xf32>
    %491 = vector.multi_reduction <maximumf>, %490, %cst_162 [1] : vector<1x40xf32> to vector<1xf32>
    %492 = vector.shape_cast %491 : vector<1xf32> to vector<1x1xf32>
    %493 = vector.broadcast %492 : vector<1x1xf32> to vector<1x40xf32>
    %494 = arith.subf %490, %493 : vector<1x40xf32>
    %495 = math.exp %494 : vector<1x40xf32>
    %cst_163 = arith.constant dense<0.000000e+00> : vector<1xf32>
    %496 = vector.multi_reduction <add>, %495, %cst_163 [1] : vector<1x40xf32> to vector<1xf32>
    %497 = vector.shape_cast %496 : vector<1xf32> to vector<1x1xf32>
    %498 = math.log %497 : vector<1x1xf32>
    %499 = vector.broadcast %498 : vector<1x1xf32> to vector<1x40xf32>
    %500 = arith.subf %494, %499 : vector<1x40xf32>
    %501 = arith.index_cast %c5_i32 : i32 to index
    %c0_164 = arith.constant 0 : index
    %c0_165 = arith.constant 0 : index
    %502 = vector.load %arg9[%501, %c0_164, %c0_165] : memref<6x1x40xf32, #tpu.memory_space<vmem>>, vector<1x1x40xf32>
    %503 = vector.shape_cast %502 : vector<1x1x40xf32> to vector<1x40xf32>
    %504 = vector.shape_cast %500 : vector<1x40xf32> to vector<1x1x40xf32>
    tpu.vector_store %arg9[%501, %c0_164, %c0_165], %504 {strides = array<i32>} : memref<6x1x40xf32, #tpu.memory_space<vmem>>, vector<1x1x40xf32>,
    %505 = arith.index_cast %c5_i32 : i32 to index
    %c0_166 = arith.constant 0 : index
    %c0_167 = arith.constant 0 : index
    %506 = vector.load %arg10[%505, %c0_166, %c0_167] : memref<6x1x32xf32, #tpu.memory_space<vmem>>, vector<1x1x32xf32>
    %507 = vector.shape_cast %506 : vector<1x1x32xf32> to vector<1x32xf32>
    %508 = vector.shape_cast %488 : vector<1x32xf32> to vector<1x1x32xf32>
    tpu.vector_store %arg10[%505, %c0_166, %c0_167], %508 {strides = array<i32>} : memref<6x1x32xf32, #tpu.memory_space<vmem>>, vector<1x1x32xf32>,
    %509 = arith.index_cast %c5_i32 : i32 to index
    %c0_168 = arith.constant 0 : index
    %c0_169 = arith.constant 0 : index
    %510 = vector.load %arg11[%509, %c0_168, %c0_169] : memref<6x1x8xf32, #tpu.memory_space<vmem>>, vector<1x1x8xf32>
    %511 = vector.shape_cast %510 : vector<1x1x8xf32> to vector<1x8xf32>
    %512 = vector.shape_cast %447 : vector<1x8xf32> to vector<1x1x8xf32>
    tpu.vector_store %arg11[%509, %c0_168, %c0_169], %512 {strides = array<i32>} : memref<6x1x8xf32, #tpu.memory_space<vmem>>, vector<1x1x8xf32>,
    %c6_i32 = arith.constant 6 : i32
    return
  }
}

</mosaic_0001>

<bundles_post_ra>
// kernel: attn_decoder_decode.1
= control target key start
LH: loop header
LB: loop body
LE: loop exit
PB: predicated region body
PF: predicated region fallthrough
CT: control target
= control target key end

     0   :  { %17 = vsyncpa [#allocation3], 0  ;;  %s1818_s20 = smov [#allocation2]   ;;  %s2451_s0 = inlined_call_operand.vmem [shape: s32[6], index: 0, kind: input, shape index: {}]   ;;  %s2452_s1 = inlined_call_operand.vmem [shape: f32[40,32], index: 1, kind: input, shape index: {}]   ;;  %s2453_s2 = inlined_call_operand.vmem [shape: f32[1,32], index: 2, kind: input, shape index: {}]   ;;  %s2454_s3 = inlined_call_operand.vmem [shape: f32[8,32], index: 3, kind: input, shape index: {}]   ;;  %s2455_s4 = inlined_call_operand.vmem [shape: f32[64,32], index: 4, kind: input, shape index: {}]   ;;  %s2456_s5 = inlined_call_operand.vmem [shape: f32[32,96], index: 5, kind: input, shape index: {}]   ;;  %s2457_s6 = inlined_call_operand.vmem [shape: f32[32,96], index: 6, kind: input, shape index: {}]   ;;  %s2458_s7 = inlined_call_operand.vmem [shape: f32[32,40], index: 7, kind: input, shape index: {}]   ;;  %s2459_s8 = inlined_call_operand.vmem [shape: f32[1,264], index: 8, kind: input, shape index: {}]   ;;  %s2460_s9 = inlined_call_operand.vmem [shape: f32[6,1,40], index: 9, kind: output, shape index: {0}]   ;;  %s2461_s10 = inlined_call_operand.vmem [shape: f32[6,1,32], index: 10, kind: output, shape index: {1}]   ;;  %s2462_s11 = inlined_call_operand.vmem [shape: f32[6,1,8], index: 11, kind: output, shape index: {2}]  }
   0x1   :  { %s23_s19 = sshll.u32 %s2451_s0, 4  ;;  %s24_s19 = int_to_ptr.vmem [resolvable:$true] %s23_s19 }
   0x2   :  { %26 = dma.vmem_to_smem %s24_s19, 16, %s1818_s20, [#allocation3]  }
   0x3   :  { %1816 = dma.done.wait [#allocation3], 16  }
   0x4   :  { %1817 = vsyncadd [#allocation3], 4294967280 }
   0x5   :  { %47 = sfence }
   0x6   :  { %v1889_v0 = vld [vmem:[%s2454_s3] sm:$0xff]  ;;  %vm107_vm0 = vcmask 261120   ;;  %vm134_vm1 = vcmask 57344   ;;  %v1911_v10 = vld [vmem:[%s2452_s1 + $0x18] sm:$0xff]  ;;  %s78_s27 = sld [smem:[#allocation2]]  ;;  %v1918_v11 = vld [vmem:[%s2452_s1 + $0x10] sm:$0xff]  ;;  %v75_v13 = vlaneseq }
   0x7   :  { %1644 = vmatpush.xpose.msk.msra.mxu1 %vm107_vm0, %v1889_v0  ;;  %v1896_v1 = vld [vmem:[%s2453_s2] sm:$0x1]  ;;  %178 = vmatpush.msra.mxu2 %v1889_v0  ;;  %v1923_v12 = vld [vmem:[%s2452_s1 + $0x8] sm:$0xff]  ;;  %v1929_v15 = vld [vmem:[%s2455_s4 + $0x18] sm:$0xff]  ;;  %vm83_vm2 = vcmask 326656   ;;  %v1819_v23 = vmov 0.0  }
   0x8   :  { %v1906_v9 = vld [vmem:[%s2452_s1 + $0x20] sm:$0xff]  ;;  %v1934_v16 = vld [vmem:[%s2455_s4 + $0x38] sm:$0xff]  ;;  %v1939_v17 = vld [vmem:[%s2455_s4 + $0x10] sm:$0xff]  ;;  %v1946_v19 = vand.u32 127, %v75_v13  ;;  %vm159_vm8 = vcmask 64512   ;;  %s1820_s25 = smov 96  }
   0x9   :  { %98 = vmatpush.msra.mxu0 %v1906_v9  ;;  %v1944_v18 = vld [vmem:[%s2452_s1] sm:$0xff]  ;;  %221 = vmatpush.msrb.mxu2 %v1929_v15  ;;  %v1953_v20 = vld [vmem:[%s2455_s4 + $0x30] sm:$0xff]  ;;  %v1959_v21 = vld [vmem:[%s2455_s4 + $0x8] sm:$0xff]  ;;  %v303_v51 = vperm.slane %v1896_v1, 0  ;;  %s1822_s26 = smov 64   ;;  %vm356_vm9 = vcmask 253952  }
   0xa   :  { %1645 = vmatmul.msk.f32.vlgmr.msra.gmra.mxu1 %vm107_vm0, %v1896_v1  ;;  %198 = vmatpush.msra.mxu3 %v1934_v16  ;;  %v1967_v22 = vld [vmem:[%s2455_s4 + $0x28] sm:$0xff]  ;;  %v1974_v25 = vld [vmem:[%s2455_s4] sm:$0xff]  ;;  %v2000_v40 = vld [vmem:[%s2457_s6 + $0x18] sm:$0xff]  ;;  %s1652_s17 = sld [smem:[#allocation2 + $0x1]] }
   0xb   :  { %99 = vmatpush.msra.mxu0 %v1911_v10  ;;  %222 = vmatpush.msrb.mxu2 %v1939_v17  ;;  %v1993_v38 = vld [vmem:[%s2455_s4 + $0x20] sm:$0xff]  ;;  %v2005_v41 = vld [vmem:[%s2457_s6 + $0x10] sm:$0xff]  ;;  %v2011_v42 = vld [vmem:[%s2457_s6 + $0x8] sm:$0xff]  ;;  %s1666_s21 = sld [smem:[#allocation2 + $0x2]] }
   0xc   :  { %v79_v14 = vstv %s78_s27  ;;  %199 = vmatpush.msra.mxu3 %v1953_v20  ;;  %v2017_v43 = vld [vmem:[%s2457_s6] sm:$0xff]  ;;  %v2024_v44 = vld [vmem:[%s2456_s5 + $0x18] sm:$0xff]  ;;  %v2039_v46 = vld [vmem:[%s2456_s5 + $0x10] sm:$0xff]  ;;  %s1680_s0 = sld [smem:[#allocation2 + $0x3]] }
   0xd   :  { %100 = vmatpush.msra.mxu0 %v1918_v11  ;;  %vm80_vm3 = vcmp.eq.s32.totalorder %v1946_v19, %v79_v14  ;;  %223 = vmatpush.msrb.mxu2 %v1959_v21  ;;  %v2046_v47 = vld [vmem:[%s2456_s5 + $0x8] sm:$0xff]  ;;  %v2053_v48 = vld [vmem:[%s2456_s5] sm:$0xff]  ;;  %s1821_s5 = smov 32   ;;  %v2087_v14 = vld [vmem:[%s2458_s7 + $0x18] sm:$0xff]  ;;  %s1694_s30 = sld [smem:[#allocation2 + $0x4]] }
   0xe   :  { %v1642_v24 = vsel %vm80_vm3, 1.0, %v1819_v23  ;;  %200 = vmatpush.msra.mxu3 %v1967_v22  ;;  %251 = vmatpush.msrb.mxu1 %v2024_v44  ;;  %v2058_v49 = vld [vmem:[%s2459_s8] sm:$0x7]  ;;  %s1708_s6 = sld [smem:[#allocation2 + $0x5]] }
   0xf   :  { %101 = vmatpush.msra.mxu0 %v1923_v12  ;;  %224 = vmatpush.msrb.mxu2 %v1974_v25  ;;  %v232_v50 = vperm.slane %v2058_v49, 0  ;;  %v2070_v57 = vperm.slane %v2058_v49, 1 }
  0x10   :  { %201 = vmatpush.msra.mxu3 %v1993_v38  ;;  %252 = vmatpush.msrb.mxu1 %v2039_v46 }
  0x11   :  { %102 = vmatpush.msra.mxu0 %v1944_v18  ;;  %233 = vrot.lane.b32.xlu1 %v232_v50, %s1820_s25 }
  0x12   :  { %1643 = vmatmul.msk.f32.vlgmr.msra.gmra.mxu0 %vm83_vm2, %v1642_v24  ;;  %273 = vmatpush.msrb.mxu3 %v2000_v40  ;;  %v2092_v24 = vld [vmem:[%s2458_s7 + $0x10] sm:$0xff] }
  0x13   :  { %253 = vmatpush.msrb.mxu1 %v2046_v47  ;;  %333 = vmatpush.msrb.mxu0 %v2087_v14 }
  0x14   :  { %274 = vmatpush.msrb.mxu3 %v2005_v41 }
  0x15   :  { %254 = vmatpush.msrb.mxu1 %v2053_v48  ;;  %334 = vmatpush.msrb.mxu0 %v2092_v24 }
  0x16   :  { %275 = vmatpush.msrb.mxu3 %v2011_v42 }
  0x17   :  { %1655 = vmatpush.xpose.msk.msra.mxu1 %vm107_vm0, %v1889_v0 }
  0x18   :  { %276 = vmatpush.msrb.mxu3 %v2017_v43 }
  0x83   :  { %v2079_v60 = vpop.permute.xlu1 %233 }
  0x87   :  { %v131_v2 = vpop.f32.mrf.mxu1 }
  0x88   :  { %v135_v3 = vsel %vm134_vm1, %v131_v2, -inf }
  0x89   :  { %136 = vmax.xlane.f32.xlu0 %v135_v3 }
  0x8f   :  { %v104_v39 = vpop.f32.mrf.mxu0 }
  0xfc   :  { %v137_v4 = vpop.xlane.xlu0 %136 }
  0xfd   :  { %v138_v5 = vsub.f32 %v131_v2, %v137_v4 }
  0xff   :  { %v139_v6 = vmul.f32 1.442695, %v138_v5 }
 0x101   :  { %1727 = vpow2.f32 %v139_v6 }
 0x107   :  { %v1728_v7 = vpop.eup %1727 }
 0x108   :  { %v141_v8 = vsel %vm134_vm1, %v1728_v7, 0.0 }
 0x109   :  { %142 = vadd.xlane.f32.xlu0 %v141_v8 }
 0x11d   :  { %304 = vrot.lane.b32.xlu0 %v303_v51, %s1821_s5 }
 0x17c   :  { %v143_v26 = vpop.xlane.xlu0 %142 }
 0x17d   :  { %1729 = vrcp.f32 %v143_v26  ;;  %v155_v30 = vand.u32 2147483648, %v143_v26  ;;  %v153_v32 = vand.u32 2147483647, %v143_v26  ;;  %vm149_vm5 = vweird.f32 %v143_v26 }
 0x17f   :  { %v156_v34 = vor.u32 1.1754944e-38, %v155_v30  ;;  %vm154_vm7 = vcmp.eq.f32.partialorder %v153_v32, 8.507059e+37 }
 0x183   :  { %v1730_v27 = vpop.eup %1729 }
 0x184   :  { %v145_v28 = vmul.f32 %v1730_v27, %v143_v26  ;;  %vm150_vm4 = vweird.f32 %v1730_v27  ;;  %v2098_v26 = vld [vmem:[%s2458_s7 + $0x8] sm:$0xff] }
 0x185   :  { %vm151_vm6 = vmor %vm149_vm5, %vm150_vm4  ;;  %335 = vmatpush.msrb.mxu0 %v2098_v26 }
 0x186   :  { %v146_v29 = vsub.f32 1.0, %v145_v28 }
 0x188   :  { %v147_v31 = vmul.f32 %v1730_v27, %v146_v29 }
 0x18a   :  { %v148_v33 = vadd.f32 %v1730_v27, %v147_v31 }
 0x18c   :  { %v152_v35 = vsel %vm151_vm6, %v1730_v27, %v148_v33  ;;  %v2104_v27 = vld [vmem:[%s2458_s7] sm:$0xff] }
 0x18d   :  { %v157_v36 = vsel %vm154_vm7, %v156_v34, %v152_v35  ;;  %336 = vmatpush.msrb.mxu0 %v2104_v27 }
 0x18e   :  { %v158_v37 = vmul.f32 %v1728_v7, %v157_v36 }
 0x18f   :  { %469 = vmatpush.msra.mxu0 %v1934_v16  ;;  %v305_v28 = vpop.permute.xlu0 %304 }
 0x190   :  { %1646 = vmatmul.msk.f32.vlgmr.msra.gmra.mxu2 %vm159_vm8, %v158_v37  ;;  %358 = vst.msk [vmem:[%s2462_s11] sm:$0x1] %vm134_vm1, %v158_v37 }
 0x191   :  { %378 = vmatpush.msra.mxu2 %v1906_v9  ;;  %470 = vmatpush.msra.mxu0 %v1953_v20 }
 0x193   :  { %379 = vmatpush.msra.mxu2 %v1911_v10  ;;  %471 = vmatpush.msra.mxu0 %v1967_v22 }
 0x195   :  { %380 = vmatpush.msra.mxu2 %v1918_v11  ;;  %472 = vmatpush.msra.mxu0 %v1993_v38 }
 0x197   :  { %381 = vmatpush.msra.mxu2 %v1923_v12 }
 0x198   :  { %1648 = vmatmul.msk.f32.vlgmr.msrb.gmra.mxu2 %vm107_vm0, %v104_v39 }
 0x199   :  { %382 = vmatpush.msra.mxu2 %v1944_v18 }
 0x19b   :  { %517 = vmatpush.msrb.mxu2 %v2024_v44 }
 0x19d   :  { %518 = vmatpush.msrb.mxu2 %v2039_v46 }
 0x19f   :  { %519 = vmatpush.msrb.mxu2 %v2046_v47 }
 0x1a1   :  { %520 = vmatpush.msrb.mxu2 %v2053_v48 }
 0x213   :  { %v180_v45 = vpop.f32.mrf.mxu2 }
 0x214   :  { %1647 = vmatmul.msk.f32.vlgmr.msra.gmra.mxu3 %vm107_vm0, %v180_v45 }
 0x215   :  { %449 = vmatpush.msra.mxu3 %v1889_v0 }
 0x21b   :  { %v226_v52 = vpop.f32.mrf.mxu2 }
 0x21c   :  { %1650 = vmatmul.msk.f32.vlgmr.msrb.gmra.mxu3 %vm107_vm0, %v1896_v1 }
 0x21d   :  { %537 = vmatpush.msrb.mxu3 %v2000_v40 }
 0x21f   :  { %538 = vmatpush.msrb.mxu3 %v2005_v41 }
 0x221   :  { %539 = vmatpush.msrb.mxu3 %v2011_v42 }
 0x223   :  { %540 = vmatpush.msrb.mxu3 %v2017_v43 }
 0x297   :  { %v203_v53 = vpop.f32.mrf.mxu3 }
 0x298   :  { %v227_v54 = vadd.f32 %v226_v52, %v203_v53  ;;  %v360_v52 = vstv %s1652_s17 }
 0x299   :  { %vm361_vm10 = vcmp.eq.s32.totalorder %v1946_v19, %v360_v52 }
 0x29a   :  { %v229_v55 = vadd.f32 %v227_v54, %v2058_v49  ;;  %v1653_v53 = vsel %vm361_vm10, 1.0, %v1819_v23 }
 0x29b   :  { %1654 = vmatmul.msk.f32.vlgmr.msra.gmra.mxu2 %vm83_vm2, %v1653_v53 }
 0x29c   :  { %v230_v56 = vmax.f32 %v229_v55, 0.0  ;;  %1669 = vmatpush.xpose.msk.msra.mxu2 %vm107_vm0, %v1889_v0 }
 0x29e   :  { %1649 = vmatmul.msk.f32.vlgmr.msrb.gmra.mxu1 %vm107_vm0, %v230_v56 }
 0x29f   :  { %v278_v58 = vpop.f32.mrf.mxu3  ;;  %492 = vmatpush.msrb.mxu1 %v1929_v15 }
 0x2a0   :  { %v279_v59 = vadd.f32 %v278_v58, %v2070_v57 }
 0x2a1   :  { %493 = vmatpush.msrb.mxu1 %v1939_v17 }
 0x2a2   :  { %287 = vrot.lane.b32.xlu1 %v279_v59, %s1822_s26 }
 0x2a3   :  { %494 = vmatpush.msrb.mxu1 %v1959_v21 }
 0x2a5   :  { %495 = vmatpush.msrb.mxu1 %v1974_v25 }
 0x314   :  { %v288_v4 = vpop.permute.xlu1 %287 }
 0x31b   :  { %v256_v61 = vpop.f32.mrf.mxu1 }
 0x31c   :  { %v257_v62 = vadd.f32 %v256_v61, %v2079_v60 }
 0x31e   :  { %v281_v63 = vadd.f32 %v279_v59, %v257_v62 }
 0x320   :  { %v282_v1 = vmul.f32 0.5, %v281_v63 }
 0x322   :  { %1731 = vtanh.f32 %v282_v1 }
 0x328   :  { %v1732_v2 = vpop.eup %1731 }
 0x329   :  { %v284_v3 = vadd.f32 1.0, %v1732_v2 }
 0x32b   :  { %v285_v5 = vmul.f32 0.5, %v284_v3 }
 0x32d   :  { %v290_v6 = vmul.f32 %v288_v4, %v285_v5  ;;  %v297_v29 = vsub.f32 1.0, %v285_v5  ;;  %v307_v31 = vmul.f32 %v305_v28, %v285_v5  ;;  %v384_v5 = vpop.f32.mrf.mxu2 }
 0x32f   :  { %292 = vrot.lane.b32.xlu2 %v290_v6, %s1822_s26 }
 0x389   :  { %v293_v7 = vpop.permute.xlu2 %292 }
 0x38a   :  { %v295_v8 = vadd.f32 %v293_v7, %v257_v62 }
 0x38c   :  { %1733 = vtanh.f32 %v295_v8 }
 0x392   :  { %v1734_v13 = vpop.eup %1733 }
 0x393   :  { %299 = vrot.lane.b32.xlu2 %v1734_v13, %s1820_s25 }
 0x3ed   :  { %v300_v30 = vpop.permute.xlu2 %299 }
 0x3ee   :  { %v302_v32 = vmul.f32 %v300_v30, %v297_v29 }
 0x3f0   :  { %v2112_v33 = vadd.f32 %v307_v31, %v302_v32 }
 0x3f2   :  { %310 = vrot.lane.b32.xlu1 %v2112_v33, %s1820_s25 }
 0x464   :  { %v311_v34 = vpop.permute.xlu1 %310 }
 0x465   :  { %357 = vst.msk [vmem:[%s2461_s10] sm:$0x1] %vm356_vm9, %v311_v34  ;;  %1651 = vmatmul.msk.f32.vlgmr.msrb.gmra.mxu0 %vm107_vm0, %v311_v34  ;;  %1656 = vmatmul.msk.f32.vlgmr.msra.gmra.mxu1 %vm107_vm0, %v311_v34 }
 0x466   :  { %586 = vmatpush.msrb.mxu0 %v2087_v14  ;;  %632 = vmatpush.msra.mxu1 %v1906_v9 }
 0x468   :  { %587 = vmatpush.msrb.mxu0 %v2092_v24  ;;  %633 = vmatpush.msra.mxu1 %v1911_v10 }
 0x46a   :  { %588 = vmatpush.msrb.mxu0 %v2098_v26  ;;  %634 = vmatpush.msra.mxu1 %v1918_v11 }
 0x46c   :  { %589 = vmatpush.msrb.mxu0 %v2104_v27  ;;  %635 = vmatpush.msra.mxu1 %v1923_v12 }
 0x46d   :  { %1659 = vmatmul.msk.f32.vlgmr.msrb.gmra.mxu1 %vm107_vm0, %v384_v5 }
 0x46e   :  { %636 = vmatpush.msra.mxu1 %v1944_v18 }
 0x470   :  { %771 = vmatpush.msrb.mxu1 %v2024_v44 }
 0x472   :  { %772 = vmatpush.msrb.mxu1 %v2039_v46 }
 0x474   :  { %773 = vmatpush.msrb.mxu1 %v2046_v47 }
 0x476   :  { %774 = vmatpush.msrb.mxu1 %v2053_v48 }
 0x4e2   :  { %v404_v35 = vpop.f32.mrf.mxu1  ;;  %v2161_v13 = vpop.f32.mrf.mxu0 }
 0x4e3   :  { %v407_v36 = vsel %vm134_vm1, %v404_v35, -inf }
 0x4e4   :  { %408 = vmax.xlane.f32.xlu2 %v407_v36 }
 0x4ea   :  { %v497_v28 = vpop.f32.mrf.mxu1 }
 0x557   :  { %v409_v37 = vpop.xlane.xlu2 %408 }
 0x558   :  { %v410_v39 = vsub.f32 %v404_v35, %v409_v37 }
 0x55a   :  { %v411_v45 = vmul.f32 1.442695, %v410_v39 }
 0x55c   :  { %1735 = vpow2.f32 %v411_v45 }
 0x562   :  { %v1736_v50 = vpop.eup %1735 }
 0x563   :  { %v413_v51 = vsel %vm134_vm1, %v1736_v50, 0.0 }
 0x564   :  { %414 = vadd.xlane.f32.xlu1 %v413_v51 }
 0x5d7   :  { %v415_v54 = vpop.xlane.xlu1 %414 }
 0x5d8   :  { %1737 = vrcp.f32 %v415_v54  ;;  %v427_v59 = vand.u32 2147483648, %v415_v54  ;;  %v425_v62 = vand.u32 2147483647, %v415_v54  ;;  %vm421_vm12 = vweird.f32 %v415_v54 }
 0x5da   :  { %v428_v1 = vor.u32 1.1754944e-38, %v427_v59  ;;  %vm426_vm14 = vcmp.eq.f32.partialorder %v425_v62, 8.507059e+37 }
 0x5de   :  { %v1738_v55 = vpop.eup %1737 }
 0x5df   :  { %v417_v56 = vmul.f32 %v1738_v55, %v415_v54  ;;  %vm422_vm11 = vweird.f32 %v1738_v55 }
 0x5e0   :  { %vm423_vm13 = vmor %vm421_vm12, %vm422_vm11 }
 0x5e1   :  { %v418_v58 = vsub.f32 1.0, %v417_v56 }
 0x5e3   :  { %v419_v61 = vmul.f32 %v1738_v55, %v418_v58 }
 0x5e5   :  { %v420_v63 = vadd.f32 %v1738_v55, %v419_v61 }
 0x5e7   :  { %v424_v2 = vsel %vm423_vm13, %v1738_v55, %v420_v63 }
 0x5e8   :  { %v429_v3 = vsel %vm426_vm14, %v428_v1, %v424_v2 }
 0x5e9   :  { %v430_v4 = vmul.f32 %v1736_v50, %v429_v3 }
 0x5eb   :  { %1657 = vmatmul.msk.f32.vlgmr.msra.gmra.mxu3 %vm159_vm8, %v430_v4  ;;  %1665 = vst.msk [vmem:[%s2462_s11 + $0x1] sm:$0x1] %vm134_vm1, %v430_v4 }
 0x5ec   :  { %703 = vmatpush.msra.mxu3 %v1889_v0 }
 0x5f3   :  { %1661 = vmatmul.msk.f32.vlgmr.msrb.gmra.mxu3 %vm107_vm0, %v311_v34 }
 0x5f4   :  { %791 = vmatpush.msrb.mxu3 %v2000_v40 }
 0x5f6   :  { %792 = vmatpush.msrb.mxu3 %v2005_v41 }
 0x5f8   :  { %793 = vmatpush.msrb.mxu3 %v2011_v42 }
 0x5fa   :  { %794 = vmatpush.msrb.mxu3 %v2017_v43 }
 0x66e   :  { %v451_v6 = vpop.f32.mrf.mxu3 }
 0x66f   :  { %1658 = vmatmul.msk.f32.vlgmr.msra.gmra.mxu0 %vm107_vm0, %v451_v6 }
 0x670   :  { %723 = vmatpush.msra.mxu0 %v1934_v16 }
 0x672   :  { %724 = vmatpush.msra.mxu0 %v1953_v20 }
 0x674   :  { %725 = vmatpush.msra.mxu0 %v1967_v22 }
 0x676   :  { %v542_v7 = vpop.f32.mrf.mxu3  ;;  %726 = vmatpush.msra.mxu0 %v1993_v38 }
 0x677   :  { %v543_v8 = vadd.f32 %v542_v7, %v2070_v57  ;;  %v614_v7 = vstv %s1666_s21 }
 0x678   :  { %vm615_vm15 = vcmp.eq.s32.totalorder %v1946_v19, %v614_v7 }
 0x679   :  { %551 = vrot.lane.b32.xlu0 %v543_v8, %s1822_s26 }
 0x6eb   :  { %v552_v51 = vpop.permute.xlu0 %551 }
 0x6ec   :  { %v474_v29 = vpop.f32.mrf.mxu0 }
 0x6ed   :  { %v498_v30 = vadd.f32 %v497_v28, %v474_v29 }
 0x6ef   :  { %v500_v31 = vadd.f32 %v498_v30, %v2058_v49 }
 0x6f1   :  { %v501_v32 = vmax.f32 %v500_v31, 0.0 }
 0x6f3   :  { %1660 = vmatmul.msk.f32.vlgmr.msrb.gmra.mxu2 %vm107_vm0, %v501_v32 }
 0x6f4   :  { %746 = vmatpush.msrb.mxu2 %v1929_v15 }
 0x6f6   :  { %747 = vmatpush.msrb.mxu2 %v1939_v17 }
 0x6f8   :  { %748 = vmatpush.msrb.mxu2 %v1959_v21 }
 0x6fa   :  { %749 = vmatpush.msrb.mxu2 %v1974_v25 }
 0x776   :  { %v522_v34 = vpop.f32.mrf.mxu2 }
 0x777   :  { %v523_v35 = vadd.f32 %v522_v34, %v2079_v60 }
 0x779   :  { %v545_v36 = vadd.f32 %v543_v8, %v523_v35  ;;  %v1667_v8 = vsel %vm615_vm15, 1.0, %v1819_v23 }
 0x77a   :  { %1668 = vmatmul.msk.f32.vlgmr.msra.gmra.mxu1 %vm83_vm2, %v1667_v8 }
 0x77b   :  { %v546_v37 = vmul.f32 0.5, %v545_v36  ;;  %1683 = vmatpush.xpose.msk.msra.mxu1 %vm107_vm0, %v1889_v0 }
 0x77d   :  { %1739 = vtanh.f32 %v546_v37 }
 0x783   :  { %v1740_v39 = vpop.eup %1739 }
 0x784   :  { %v548_v45 = vadd.f32 1.0, %v1740_v39 }
 0x786   :  { %v549_v50 = vmul.f32 0.5, %v548_v45 }
 0x788   :  { %v554_v52 = vmul.f32 %v552_v51, %v549_v50  ;;  %v561_v56 = vsub.f32 1.0, %v549_v50  ;;  %v567_v59 = vmul.f32 %v549_v50, %v2112_v33 }
 0x78a   :  { %556 = vrot.lane.b32.xlu0 %v554_v52, %s1822_s26 }
 0x7f7   :  { %v638_v51 = vpop.f32.mrf.mxu1 }
 0x7fc   :  { %v557_v53 = vpop.permute.xlu0 %556 }
 0x7fd   :  { %v559_v54 = vadd.f32 %v557_v53, %v523_v35 }
 0x7ff   :  { %1741 = vtanh.f32 %v559_v54 }
 0x805   :  { %v1742_v55 = vpop.eup %1741 }
 0x806   :  { %563 = vrot.lane.b32.xlu0 %v1742_v55, %s1820_s25 }
 0x878   :  { %v564_v58 = vpop.permute.xlu0 %563 }
 0x879   :  { %v566_v61 = vmul.f32 %v564_v58, %v561_v56 }
 0x87b   :  { %v2173_v62 = vadd.f32 %v567_v59, %v566_v61 }
 0x87d   :  { %570 = vrot.lane.b32.xlu2 %v2173_v62, %s1820_s25 }
 0x8d7   :  { %v571_v63 = vpop.permute.xlu2 %570 }
 0x8d8   :  { %1664 = vst.msk [vmem:[%s2461_s10 + $0x1] sm:$0x1] %vm356_vm9, %v571_v63  ;;  %1662 = vmatmul.msk.f32.vlgmr.msrb.gmra.mxu0 %vm107_vm0, %v571_v63  ;;  %1670 = vmatmul.msk.f32.vlgmr.msra.gmra.mxu2 %vm107_vm0, %v571_v63 }
 0x8d9   :  { %840 = vmatpush.msrb.mxu0 %v2087_v14  ;;  %886 = vmatpush.msra.mxu2 %v1906_v9 }
 0x8db   :  { %841 = vmatpush.msrb.mxu0 %v2092_v24  ;;  %887 = vmatpush.msra.mxu2 %v1911_v10 }
 0x8dd   :  { %842 = vmatpush.msrb.mxu0 %v2098_v26  ;;  %888 = vmatpush.msra.mxu2 %v1918_v11 }
 0x8df   :  { %843 = vmatpush.msrb.mxu0 %v2104_v27  ;;  %889 = vmatpush.msra.mxu2 %v1923_v12 }
 0x8e0   :  { %1673 = vmatmul.msk.f32.vlgmr.msrb.gmra.mxu2 %vm107_vm0, %v638_v51 }
 0x8e1   :  { %890 = vmatpush.msra.mxu2 %v1944_v18 }
 0x8e3   :  { %1025 = vmatpush.msrb.mxu2 %v2024_v44 }
 0x8e5   :  { %1026 = vmatpush.msrb.mxu2 %v2039_v46 }
 0x8e7   :  { %1027 = vmatpush.msrb.mxu2 %v2046_v47 }
 0x8e9   :  { %1028 = vmatpush.msrb.mxu2 %v2053_v48 }
 0x955   :  { %v2222_v55 = vpop.f32.mrf.mxu0 }
 0x95b   :  { %v658_v33 = vpop.f32.mrf.mxu2 }
 0x95c   :  { %v661_v1 = vsel %vm134_vm1, %v658_v33, -inf }
 0x95d   :  { %662 = vmax.xlane.f32.xlu0 %v661_v1 }
 0x963   :  { %v751_v56 = vpop.f32.mrf.mxu2 }
 0x9d0   :  { %v663_v2 = vpop.xlane.xlu0 %662 }
 0x9d1   :  { %v664_v3 = vsub.f32 %v658_v33, %v663_v2 }
 0x9d3   :  { %v665_v4 = vmul.f32 1.442695, %v664_v3 }
 0x9d5   :  { %1743 = vpow2.f32 %v665_v4 }
 0x9db   :  { %v1744_v5 = vpop.eup %1743 }
 0x9dc   :  { %v667_v6 = vsel %vm134_vm1, %v1744_v5, 0.0 }
 0x9dd   :  { %668 = vadd.xlane.f32.xlu1 %v667_v6 }
 0xa50   :  { %v669_v28 = vpop.xlane.xlu1 %668 }
 0xa51   :  { %1745 = vrcp.f32 %v669_v28  ;;  %v681_v32 = vand.u32 2147483648, %v669_v28  ;;  %v679_v35 = vand.u32 2147483647, %v669_v28  ;;  %vm675_vm4 = vweird.f32 %v669_v28 }
 0xa53   :  { %v682_v37 = vor.u32 1.1754944e-38, %v681_v32  ;;  %vm680_vm6 = vcmp.eq.f32.partialorder %v679_v35, 8.507059e+37 }
 0xa57   :  { %v1746_v29 = vpop.eup %1745 }
 0xa58   :  { %v671_v30 = vmul.f32 %v1746_v29, %v669_v28  ;;  %vm676_vm3 = vweird.f32 %v1746_v29 }
 0xa59   :  { %vm677_vm5 = vmor %vm675_vm4, %vm676_vm3 }
 0xa5a   :  { %v672_v31 = vsub.f32 1.0, %v671_v30 }
 0xa5c   :  { %v673_v34 = vmul.f32 %v1746_v29, %v672_v31 }
 0xa5e   :  { %v674_v36 = vadd.f32 %v1746_v29, %v673_v34 }
 0xa60   :  { %v678_v39 = vsel %vm677_vm5, %v1746_v29, %v674_v36 }
 0xa61   :  { %v683_v45 = vsel %vm680_vm6, %v682_v37, %v678_v39 }
 0xa62   :  { %v684_v50 = vmul.f32 %v1744_v5, %v683_v45 }
 0xa64   :  { %1671 = vmatmul.msk.f32.vlgmr.msra.gmra.mxu3 %vm159_vm8, %v684_v50  ;;  %1679 = vst.msk [vmem:[%s2462_s11 + $0x2] sm:$0x1] %vm134_vm1, %v684_v50 }
 0xa65   :  { %957 = vmatpush.msra.mxu3 %v1889_v0 }
 0xa6c   :  { %1675 = vmatmul.msk.f32.vlgmr.msrb.gmra.mxu3 %vm107_vm0, %v571_v63 }
 0xa6d   :  { %1045 = vmatpush.msrb.mxu3 %v2000_v40 }
 0xa6f   :  { %1046 = vmatpush.msrb.mxu3 %v2005_v41 }
 0xa71   :  { %1047 = vmatpush.msrb.mxu3 %v2011_v42 }
 0xa73   :  { %1048 = vmatpush.msrb.mxu3 %v2017_v43 }
 0xae7   :  { %v705_v52 = vpop.f32.mrf.mxu3 }
 0xae8   :  { %1672 = vmatmul.msk.f32.vlgmr.msra.gmra.mxu0 %vm107_vm0, %v705_v52 }
 0xae9   :  { %977 = vmatpush.msra.mxu0 %v1934_v16 }
 0xaeb   :  { %978 = vmatpush.msra.mxu0 %v1953_v20 }
 0xaed   :  { %979 = vmatpush.msra.mxu0 %v1967_v22 }
 0xaef   :  { %v796_v53 = vpop.f32.mrf.mxu3  ;;  %980 = vmatpush.msra.mxu0 %v1993_v38 }
 0xaf0   :  { %v797_v54 = vadd.f32 %v796_v53, %v2070_v57 }
 0xaf2   :  { %805 = vrot.lane.b32.xlu1 %v797_v54, %s1822_s26 }
 0xb64   :  { %v806_v7 = vpop.permute.xlu1 %805 }
 0xb65   :  { %v728_v58 = vpop.f32.mrf.mxu0 }
 0xb66   :  { %v752_v59 = vadd.f32 %v751_v56, %v728_v58 }
 0xb68   :  { %v754_v61 = vadd.f32 %v752_v59, %v2058_v49 }
 0xb6a   :  { %v755_v63 = vmax.f32 %v754_v61, 0.0 }
 0xb6c   :  { %1674 = vmatmul.msk.f32.vlgmr.msrb.gmra.mxu1 %vm107_vm0, %v755_v63 }
 0xb6d   :  { %1000 = vmatpush.msrb.mxu1 %v1929_v15 }
 0xb6f   :  { %1001 = vmatpush.msrb.mxu1 %v1939_v17 }
 0xb71   :  { %1002 = vmatpush.msrb.mxu1 %v1959_v21 }
 0xb73   :  { %1003 = vmatpush.msrb.mxu1 %v1974_v25 }
 0xbe9   :  { %v776_v33 = vpop.f32.mrf.mxu1 }
 0xbea   :  { %v777_v1 = vadd.f32 %v776_v33, %v2079_v60 }
 0xbec   :  { %v799_v2 = vadd.f32 %v797_v54, %v777_v1  ;;  %v868_v54 = vstv %s1680_s0 }
 0xbed   :  { %vm869_vm7 = vcmp.eq.s32.totalorder %v1946_v19, %v868_v54 }
 0xbee   :  { %v800_v3 = vmul.f32 0.5, %v799_v2  ;;  %v1681_v56 = vsel %vm869_vm7, 1.0, %v1819_v23 }
 0xbef   :  { %1682 = vmatmul.msk.f32.vlgmr.msra.gmra.mxu2 %vm83_vm2, %v1681_v56 }
 0xbf0   :  { %1747 = vtanh.f32 %v800_v3  ;;  %1697 = vmatpush.xpose.msk.msra.mxu2 %vm107_vm0, %v1889_v0 }
 0xbf6   :  { %v1748_v4 = vpop.eup %1747 }
 0xbf7   :  { %v802_v5 = vadd.f32 1.0, %v1748_v4 }
 0xbf9   :  { %v803_v6 = vmul.f32 0.5, %v802_v5 }
 0xbfb   :  { %v808_v8 = vmul.f32 %v806_v7, %v803_v6  ;;  %v815_v31 = vsub.f32 1.0, %v803_v6  ;;  %v821_v34 = vmul.f32 %v803_v6, %v2173_v62 }
 0xbfd   :  { %810 = vrot.lane.b32.xlu2 %v808_v8, %s1822_s26 }
 0xc57   :  { %v811_v28 = vpop.permute.xlu2 %810 }
 0xc58   :  { %v813_v29 = vadd.f32 %v811_v28, %v777_v1 }
 0xc5a   :  { %1749 = vtanh.f32 %v813_v29 }
 0xc60   :  { %v1750_v30 = vpop.eup %1749 }
 0xc61   :  { %817 = vrot.lane.b32.xlu2 %v1750_v30, %s1820_s25 }
 0xc72   :  { %v892_v8 = vpop.f32.mrf.mxu2 }
 0xcbb   :  { %v818_v32 = vpop.permute.xlu2 %817 }
 0xcbc   :  { %v820_v35 = vmul.f32 %v818_v32, %v815_v31 }
 0xcbe   :  { %v2234_v36 = vadd.f32 %v821_v34, %v820_v35 }
 0xcc0   :  { %824 = vrot.lane.b32.xlu2 %v2234_v36, %s1820_s25 }
 0xd1a   :  { %v825_v37 = vpop.permute.xlu2 %824 }
 0xd1b   :  { %1678 = vst.msk [vmem:[%s2461_s10 + $0x2] sm:$0x1] %vm356_vm9, %v825_v37  ;;  %1676 = vmatmul.msk.f32.vlgmr.msrb.gmra.mxu0 %vm107_vm0, %v825_v37  ;;  %1684 = vmatmul.msk.f32.vlgmr.msra.gmra.mxu1 %vm107_vm0, %v825_v37 }
 0xd1c   :  { %1094 = vmatpush.msrb.mxu0 %v2087_v14  ;;  %1140 = vmatpush.msra.mxu1 %v1906_v9 }
 0xd1e   :  { %1095 = vmatpush.msrb.mxu0 %v2092_v24  ;;  %1141 = vmatpush.msra.mxu1 %v1911_v10 }
 0xd20   :  { %1096 = vmatpush.msrb.mxu0 %v2098_v26  ;;  %1142 = vmatpush.msra.mxu1 %v1918_v11 }
 0xd22   :  { %1097 = vmatpush.msrb.mxu0 %v2104_v27  ;;  %1143 = vmatpush.msra.mxu1 %v1923_v12 }
 0xd23   :  { %1687 = vmatmul.msk.f32.vlgmr.msrb.gmra.mxu1 %vm107_vm0, %v892_v8 }
 0xd24   :  { %1144 = vmatpush.msra.mxu1 %v1944_v18 }
 0xd26   :  { %1279 = vmatpush.msrb.mxu1 %v2024_v44 }
 0xd28   :  { %1280 = vmatpush.msrb.mxu1 %v2039_v46 }
 0xd2a   :  { %1281 = vmatpush.msrb.mxu1 %v2046_v47 }
 0xd2c   :  { %1282 = vmatpush.msrb.mxu1 %v2053_v48 }
 0xd98   :  { %v912_v62 = vpop.f32.mrf.mxu1  ;;  %v2283_v31 = vpop.f32.mrf.mxu0 }
 0xd99   :  { %v915_v39 = vsel %vm134_vm1, %v912_v62, -inf }
 0xd9a   :  { %916 = vmax.xlane.f32.xlu1 %v915_v39 }
 0xda0   :  { %v1005_v32 = vpop.f32.mrf.mxu1 }
 0xe0d   :  { %v917_v45 = vpop.xlane.xlu1 %916 }
 0xe0e   :  { %v918_v50 = vsub.f32 %v912_v62, %v917_v45 }
 0xe10   :  { %v919_v51 = vmul.f32 1.442695, %v918_v50 }
 0xe12   :  { %1751 = vpow2.f32 %v919_v51 }
 0xe18   :  { %v1752_v52 = vpop.eup %1751 }
 0xe19   :  { %v921_v53 = vsel %vm134_vm1, %v1752_v52, 0.0 }
 0xe1a   :  { %922 = vadd.xlane.f32.xlu0 %v921_v53 }
 0xe8d   :  { %v923_v58 = vpop.xlane.xlu0 %922 }
 0xe8e   :  { %1753 = vrcp.f32 %v923_v58  ;;  %v935_v33 = vand.u32 2147483648, %v923_v58  ;;  %v933_v2 = vand.u32 2147483647, %v923_v58  ;;  %vm929_vm11 = vweird.f32 %v923_v58 }
 0xe90   :  { %v936_v4 = vor.u32 1.1754944e-38, %v935_v33  ;;  %vm934_vm13 = vcmp.eq.f32.partialorder %v933_v2, 8.507059e+37 }
 0xe94   :  { %v1754_v59 = vpop.eup %1753 }
 0xe95   :  { %v925_v61 = vmul.f32 %v1754_v59, %v923_v58  ;;  %vm930_vm10 = vweird.f32 %v1754_v59 }
 0xe96   :  { %vm931_vm12 = vmor %vm929_vm11, %vm930_vm10 }
 0xe97   :  { %v926_v63 = vsub.f32 1.0, %v925_v61 }
 0xe99   :  { %v927_v1 = vmul.f32 %v1754_v59, %v926_v63 }
 0xe9b   :  { %v928_v3 = vadd.f32 %v1754_v59, %v927_v1 }
 0xe9d   :  { %v932_v5 = vsel %vm931_vm12, %v1754_v59, %v928_v3 }
 0xe9e   :  { %v937_v6 = vsel %vm934_vm13, %v936_v4, %v932_v5 }
 0xe9f   :  { %v938_v7 = vmul.f32 %v1752_v52, %v937_v6 }
 0xea1   :  { %1685 = vmatmul.msk.f32.vlgmr.msra.gmra.mxu3 %vm159_vm8, %v938_v7  ;;  %1693 = vst.msk [vmem:[%s2462_s11 + $0x3] sm:$0x1] %vm134_vm1, %v938_v7 }
 0xea2   :  { %1211 = vmatpush.msra.mxu3 %v1889_v0 }
 0xea9   :  { %1689 = vmatmul.msk.f32.vlgmr.msrb.gmra.mxu3 %vm107_vm0, %v825_v37 }
 0xeaa   :  { %1299 = vmatpush.msrb.mxu3 %v2000_v40 }
 0xeac   :  { %1300 = vmatpush.msrb.mxu3 %v2005_v41 }
 0xeae   :  { %1301 = vmatpush.msrb.mxu3 %v2011_v42 }
 0xeb0   :  { %1302 = vmatpush.msrb.mxu3 %v2017_v43 }
 0xf24   :  { %v959_v28 = vpop.f32.mrf.mxu3 }
 0xf25   :  { %1686 = vmatmul.msk.f32.vlgmr.msra.gmra.mxu0 %vm107_vm0, %v959_v28 }
 0xf26   :  { %1231 = vmatpush.msra.mxu0 %v1934_v16 }
 0xf28   :  { %1232 = vmatpush.msra.mxu0 %v1953_v20 }
 0xf2a   :  { %1233 = vmatpush.msra.mxu0 %v1967_v22 }
 0xf2c   :  { %v1050_v29 = vpop.f32.mrf.mxu3  ;;  %1234 = vmatpush.msra.mxu0 %v1993_v38 }
 0xf2d   :  { %v1051_v30 = vadd.f32 %v1050_v29, %v2070_v57 }
 0xf2f   :  { %1059 = vrot.lane.b32.xlu2 %v1051_v30, %s1822_s26 }
 0xf89   :  { %v1060_v56 = vpop.permute.xlu2 %1059 }
 0xfa2   :  { %v982_v34 = vpop.f32.mrf.mxu0 }
 0xfa3   :  { %v1006_v35 = vadd.f32 %v1005_v32, %v982_v34 }
 0xfa5   :  { %v1008_v37 = vadd.f32 %v1006_v35, %v2058_v49 }
 0xfa7   :  { %v1009_v62 = vmax.f32 %v1008_v37, 0.0 }
 0xfa9   :  { %1688 = vmatmul.msk.f32.vlgmr.msrb.gmra.mxu2 %vm107_vm0, %v1009_v62 }
 0xfaa   :  { %1254 = vmatpush.msrb.mxu2 %v1929_v15 }
 0xfac   :  { %1255 = vmatpush.msrb.mxu2 %v1939_v17 }
 0xfae   :  { %1256 = vmatpush.msrb.mxu2 %v1959_v21 }
 0xfb0   :  { %1257 = vmatpush.msrb.mxu2 %v1974_v25 }
0x102c   :  { %v1030_v39 = vpop.f32.mrf.mxu2 }
0x102d   :  { %v1031_v45 = vadd.f32 %v1030_v39, %v2079_v60 }
0x102f   :  { %v1053_v50 = vadd.f32 %v1051_v30, %v1031_v45 }
0x1031   :  { %v1054_v51 = vmul.f32 0.5, %v1053_v50 }
0x1033   :  { %1755 = vtanh.f32 %v1054_v51 }
0x1039   :  { %v1756_v52 = vpop.eup %1755 }
0x103a   :  { %v1056_v53 = vadd.f32 1.0, %v1756_v52 }
0x103c   :  { %v1057_v54 = vmul.f32 0.5, %v1056_v53 }
0x103e   :  { %v1062_v58 = vmul.f32 %v1060_v56, %v1057_v54  ;;  %v1069_v21 = vsub.f32 1.0, %v1057_v54  ;;  %v1075_v63 = vmul.f32 %v1057_v54, %v2234_v36 }
0x1040   :  { %1064 = vrot.lane.b32.xlu0 %v1062_v58, %s1822_s26 }
0x10b2   :  { %v1065_v15 = vpop.permute.xlu0 %1064 }
0x10b3   :  { %v1067_v59 = vadd.f32 %v1065_v15, %v1031_v45 }
0x10b5   :  { %1757 = vtanh.f32 %v1067_v59 }
0x10bb   :  { %v1758_v17 = vpop.eup %1757 }
0x10bc   :  { %1071 = vrot.lane.b32.xlu2 %v1758_v17, %s1820_s25 }
0x1116   :  { %v1072_v61 = vpop.permute.xlu2 %1071 }
0x1117   :  { %v1074_v33 = vmul.f32 %v1072_v61, %v1069_v21 }
0x1119   :  { %v2295_v1 = vadd.f32 %v1075_v63, %v1074_v33 }
0x111b   :  { %1078 = vrot.lane.b32.xlu2 %v2295_v1, %s1820_s25 }
0x1175   :  { %v1079_v2 = vpop.permute.xlu2 %1078 }
0x1176   :  { %1692 = vst.msk [vmem:[%s2461_s10 + $0x3] sm:$0x1] %vm356_vm9, %v1079_v2  ;;  %1690 = vmatmul.msk.f32.vlgmr.msrb.gmra.mxu0 %vm107_vm0, %v1079_v2  ;;  %1698 = vmatmul.msk.f32.vlgmr.msra.gmra.mxu2 %vm107_vm0, %v1079_v2 }
0x1177   :  { %1348 = vmatpush.msrb.mxu0 %v2087_v14  ;;  %1394 = vmatpush.msra.mxu2 %v1906_v9 }
0x1179   :  { %1349 = vmatpush.msrb.mxu0 %v2092_v24  ;;  %1395 = vmatpush.msra.mxu2 %v1911_v10 }
0x117b   :  { %1350 = vmatpush.msrb.mxu0 %v2098_v26  ;;  %1396 = vmatpush.msra.mxu2 %v1918_v11  ;;  %v1122_v11 = vstv %s1694_s30 }
0x117c   :  { %vm1123_vm14 = vcmp.eq.s32.totalorder %v1946_v19, %v1122_v11 }
0x117d   :  { %1351 = vmatpush.msrb.mxu0 %v2104_v27  ;;  %1397 = vmatpush.msra.mxu2 %v1923_v12  ;;  %v1695_v12 = vsel %vm1123_vm14, 1.0, %v1819_v23 }
0x117e   :  { %1696 = vmatmul.msk.f32.vlgmr.msra.gmra.mxu1 %vm83_vm2, %v1695_v12 }
0x117f   :  { %1398 = vmatpush.msra.mxu2 %v1944_v18  ;;  %1711 = vmatpush.xpose.msk.msra.mxu1 %vm107_vm0, %v1889_v0  ;;  %v1799_v0 = vld [vmem:[%s2454_s3] sm:$0xff] }
0x11f9   :  { %v1166_v36 = vpop.f32.mrf.mxu2 }
0x11fa   :  { %v1169_v3 = vsel %vm134_vm1, %v1166_v36, -inf }
0x11fb   :  { %1170 = vmax.xlane.f32.xlu2 %v1169_v3  ;;  %v1146_v45 = vpop.f32.mrf.mxu1 }
0x11fc   :  { %1701 = vmatmul.msk.f32.vlgmr.msrb.gmra.mxu2 %vm107_vm0, %v1146_v45 }
0x11fd   :  { %1533 = vmatpush.msrb.mxu2 %v2024_v44 }
0x11ff   :  { %1534 = vmatpush.msrb.mxu2 %v2039_v46 }
0x1201   :  { %1535 = vmatpush.msrb.mxu2 %v2046_v47 }
0x1203   :  { %1536 = vmatpush.msrb.mxu2 %v2053_v48 }
0x126e   :  { %v1171_v4 = vpop.xlane.xlu2 %1170 }
0x126f   :  { %v1172_v9 = vsub.f32 %v1166_v36, %v1171_v4 }
0x1271   :  { %v1173_v5 = vmul.f32 1.442695, %v1172_v9 }
0x1273   :  { %1759 = vpow2.f32 %v1173_v5 }
0x1279   :  { %v1760_v6 = vpop.eup %1759 }
0x127a   :  { %v1175_v10 = vsel %vm134_vm1, %v1760_v6, 0.0 }
0x127b   :  { %1176 = vadd.xlane.f32.xlu0 %v1175_v10 }
0x12ee   :  { %v1177_v18 = vpop.xlane.xlu0 %1176 }
0x12ef   :  { %1761 = vrcp.f32 %v1177_v18  ;;  %v1189_v29 = vand.u32 2147483648, %v1177_v18  ;;  %v1187_v32 = vand.u32 2147483647, %v1177_v18  ;;  %vm1183_vm3 = vweird.f32 %v1177_v18 }
0x12f1   :  { %v1190_v35 = vor.u32 1.1754944e-38, %v1189_v29  ;;  %vm1188_vm5 = vcmp.eq.f32.partialorder %v1187_v32, 8.507059e+37 }
0x12f5   :  { %v1762_v7 = vpop.eup %1761 }
0x12f6   :  { %v1179_v8 = vmul.f32 %v1762_v7, %v1177_v18  ;;  %vm1184_vm15 = vweird.f32 %v1762_v7 }
0x12f7   :  { %vm1185_vm4 = vmor %vm1183_vm3, %vm1184_vm15 }
0x12f8   :  { %v1180_v28 = vsub.f32 1.0, %v1179_v8 }
0x12fa   :  { %v1181_v30 = vmul.f32 %v1762_v7, %v1180_v28 }
0x12fc   :  { %v1182_v34 = vadd.f32 %v1762_v7, %v1181_v30 }
0x12fe   :  { %v1186_v37 = vsel %vm1185_vm4, %v1762_v7, %v1182_v34 }
0x12ff   :  { %v1191_v62 = vsel %vm1188_vm5, %v1190_v35, %v1186_v37 }
0x1300   :  { %v1192_v39 = vmul.f32 %v1760_v6, %v1191_v62 }
0x1302   :  { %1699 = vmatmul.msk.f32.vlgmr.msra.gmra.mxu3 %vm159_vm8, %v1192_v39  ;;  %1707 = vst.msk [vmem:[%s2462_s11 + $0x4] sm:$0x1] %vm134_vm1, %v1192_v39 }
0x1303   :  { %1465 = vmatpush.msra.mxu3 %v1799_v0 }
0x130a   :  { %1703 = vmatmul.msk.f32.vlgmr.msrb.gmra.mxu3 %vm107_vm0, %v1079_v2 }
0x130b   :  { %1553 = vmatpush.msrb.mxu3 %v2000_v40 }
0x130d   :  { %1554 = vmatpush.msrb.mxu3 %v2005_v41 }
0x130f   :  { %1555 = vmatpush.msrb.mxu3 %v2011_v42  ;;  %v2346_v42 = vpop.f32.mrf.mxu0 }
0x1311   :  { %1556 = vmatpush.msrb.mxu3 %v2017_v43  ;;  %v1259_v43 = vpop.f32.mrf.mxu2 }
0x1385   :  { %v1213_v50 = vpop.f32.mrf.mxu3 }
0x1386   :  { %1700 = vmatmul.msk.f32.vlgmr.msra.gmra.mxu0 %vm107_vm0, %v1213_v50  ;;  %v1803_v50 = vld [vmem:[%s2459_s8] sm:$0x7] }
0x1387   :  { %1485 = vmatpush.msra.mxu0 %v1934_v16  ;;  %v1800_v16 = vld [vmem:[%s2455_s4 + $0x18] sm:$0xff] }
0x1389   :  { %1486 = vmatpush.msra.mxu0 %v1953_v20  ;;  %v1801_v20 = vld [vmem:[%s2455_s4 + $0x10] sm:$0xff] }
0x138b   :  { %1487 = vmatpush.msra.mxu0 %v1967_v22  ;;  %v1802_v22 = vld [vmem:[%s2455_s4 + $0x8] sm:$0xff] }
0x138d   :  { %v1304_v40 = vpop.f32.mrf.mxu3  ;;  %1488 = vmatpush.msra.mxu0 %v1993_v38 }
0x138e   :  { %v1305_v41 = vadd.f32 %v1304_v40, %v2070_v57 }
0x1390   :  { %1313 = vrot.lane.b32.xlu1 %v1305_v41, %s1822_s26 }
0x1402   :  { %v1314_v58 = vpop.permute.xlu1 %1313 }
0x1403   :  { %v1236_v44 = vpop.f32.mrf.mxu0 }
0x1404   :  { %v1260_v46 = vadd.f32 %v1259_v43, %v1236_v44 }
0x1406   :  { %v1262_v47 = vadd.f32 %v1260_v46, %v2058_v49 }
0x1408   :  { %v1263_v48 = vmax.f32 %v1262_v47, 0.0 }
0x140a   :  { %1702 = vmatmul.msk.f32.vlgmr.msrb.gmra.mxu1 %vm107_vm0, %v1263_v48 }
0x140b   :  { %1508 = vmatpush.msrb.mxu1 %v1800_v16 }
0x140d   :  { %1509 = vmatpush.msrb.mxu1 %v1801_v20 }
0x140f   :  { %1510 = vmatpush.msrb.mxu1 %v1802_v22 }
0x1411   :  { %1511 = vmatpush.msrb.mxu1 %v1974_v25 }
0x1487   :  { %v1284_v38 = vpop.f32.mrf.mxu1 }
0x1488   :  { %v1285_v49 = vadd.f32 %v1284_v38, %v2079_v60 }
0x148a   :  { %v1307_v51 = vadd.f32 %v1305_v41, %v1285_v49 }
0x148c   :  { %v1308_v52 = vmul.f32 0.5, %v1307_v51 }
0x148e   :  { %1763 = vtanh.f32 %v1308_v52 }
0x1494   :  { %v1764_v53 = vpop.eup %1763 }
0x1495   :  { %v1310_v54 = vadd.f32 1.0, %v1764_v53 }
0x1497   :  { %v1311_v56 = vmul.f32 0.5, %v1310_v54 }
0x1499   :  { %v1316_v15 = vmul.f32 %v1314_v58, %v1311_v56  ;;  %v1323_v25 = vsub.f32 1.0, %v1311_v56  ;;  %v1329_v63 = vmul.f32 %v1311_v56, %v2295_v1 }
0x149b   :  { %1318 = vrot.lane.b32.xlu1 %v1316_v15, %s1822_s26 }
0x150d   :  { %v1319_v59 = vpop.permute.xlu1 %1318 }
0x150e   :  { %v1321_v17 = vadd.f32 %v1319_v59, %v1285_v49 }
0x1510   :  { %1765 = vtanh.f32 %v1321_v17 }
0x1516   :  { %v1766_v21 = vpop.eup %1765 }
0x1517   :  { %1325 = vrot.lane.b32.xlu2 %v1766_v21, %s1820_s25 }
0x1571   :  { %v1326_v61 = vpop.permute.xlu2 %1325 }
0x1572   :  { %v1328_v33 = vmul.f32 %v1326_v61, %v1323_v25 }
0x1574   :  { %v2364_v2 = vadd.f32 %v1329_v63, %v1328_v33 }
0x1576   :  { %1332 = vrot.lane.b32.xlu0 %v2364_v2, %s1820_s25 }
0x15e8   :  { %v1333_v36 = vpop.permute.xlu0 %1332 }
0x15e9   :  { %1706 = vst.msk [vmem:[%s2461_s10 + $0x4] sm:$0x1] %vm356_vm9, %v1333_v36  ;;  %1704 = vmatmul.msk.f32.vlgmr.msrb.gmra.mxu0 %vm107_vm0, %v1333_v36  ;;  %1712 = vmatmul.msk.f32.vlgmr.msra.gmra.mxu1 %vm107_vm0, %v1333_v36 }
0x15ea   :  { %1602 = vmatpush.msrb.mxu0 %v2087_v14  ;;  %v1376_v14 = vstv %s1708_s6 }
0x15eb   :  { %vm1377_vm6 = vcmp.eq.s32.totalorder %v1946_v19, %v1376_v14 }
0x15ec   :  { %1603 = vmatpush.msrb.mxu0 %v2092_v24  ;;  %v1709_v24 = vsel %vm1377_vm6, 1.0, %v1819_v23 }
0x15ed   :  { %1710 = vmatmul.msk.f32.vlgmr.msra.gmra.mxu2 %vm83_vm2, %v1709_v24 }
0x15ee   :  { %1604 = vmatpush.msrb.mxu0 %v2098_v26 }
0x15f0   :  { %1605 = vmatpush.msrb.mxu0 %v2104_v27 }
0x1666   :  { %v1420_v1 = vpop.f32.mrf.mxu1  ;;  %v1353_v62 = vpop.f32.mrf.mxu0 }
0x1667   :  { %v1423_v3 = vsel %vm134_vm1, %v1420_v1, -inf }
0x1668   :  { %1424 = vmax.xlane.f32.xlu1 %v1423_v3 }
0x1670   :  { %v1400_v23 = vpop.f32.mrf.mxu2 }
0x1671   :  { %1715 = vmatmul.msk.f32.vlgmr.msrb.gmra.mxu1 %vm107_vm0, %v1400_v23 }
0x16db   :  { %v1425_v4 = vpop.xlane.xlu1 %1424 }
0x16dc   :  { %v1426_v9 = vsub.f32 %v1420_v1, %v1425_v4 }
0x16de   :  { %v1427_v5 = vmul.f32 1.442695, %v1426_v9 }
0x16e0   :  { %1767 = vpow2.f32 %v1427_v5 }
0x16e6   :  { %v1768_v6 = vpop.eup %1767 }
0x16e7   :  { %v1429_v10 = vsel %vm134_vm1, %v1768_v6, 0.0 }
0x16e8   :  { %1430 = vadd.xlane.f32.xlu0 %v1429_v10 }
0x16ee   :  { %v1513_v39 = vpop.f32.mrf.mxu1 }
0x175b   :  { %v1431_v26 = vpop.xlane.xlu0 %1430 }
0x175c   :  { %1769 = vrcp.f32 %v1431_v26  ;;  %v1443_v18 = vand.u32 2147483648, %v1431_v26  ;;  %v1441_v8 = vand.u32 2147483647, %v1431_v26  ;;  %vm1437_vm10 = vweird.f32 %v1431_v26 }
0x175e   :  { %v1444_v29 = vor.u32 1.1754944e-38, %v1443_v18  ;;  %vm1442_vm12 = vcmp.eq.f32.partialorder %v1441_v8, 8.507059e+37 }
0x1762   :  { %v1770_v27 = vpop.eup %1769 }
0x1763   :  { %v1433_v11 = vmul.f32 %v1770_v27, %v1431_v26  ;;  %vm1438_vm7 = vweird.f32 %v1770_v27 }
0x1764   :  { %vm1439_vm11 = vmor %vm1437_vm10, %vm1438_vm7 }
0x1765   :  { %v1434_v12 = vsub.f32 1.0, %v1433_v11 }
0x1767   :  { %v1435_v7 = vmul.f32 %v1770_v27, %v1434_v12 }
0x1769   :  { %v1436_v28 = vadd.f32 %v1770_v27, %v1435_v7 }
0x176b   :  { %v1440_v30 = vsel %vm1439_vm11, %v1770_v27, %v1436_v28 }
0x176c   :  { %v1445_v19 = vsel %vm1442_vm12, %v1444_v29, %v1440_v30 }
0x176d   :  { %v1446_v32 = vmul.f32 %v1768_v6, %v1445_v19 }
0x176f   :  { %1713 = vmatmul.msk.f32.vlgmr.msra.gmra.mxu3 %vm159_vm8, %v1446_v32  ;;  %1721 = vst.msk [vmem:[%s2462_s11 + $0x5] sm:$0x1] %vm134_vm1, %v1446_v32  ;;  %vm341_vm1 = vcmask 319488  }
0x1777   :  { %1717 = vmatmul.msk.f32.vlgmr.msrb.gmra.mxu3 %vm107_vm0, %v1333_v36 }
0x17f2   :  { %v1467_v34 = vpop.f32.mrf.mxu3 }
0x17f3   :  { %1714 = vmatmul.msk.f32.vlgmr.msra.gmra.mxu0 %vm107_vm0, %v1467_v34 }
0x17fa   :  { %v1558_v35 = vpop.f32.mrf.mxu3 }
0x17fb   :  { %v1559_v37 = vadd.f32 %v1558_v35, %v2070_v57 }
0x17fd   :  { %1567 = vrot.lane.b32.xlu2 %v1559_v37, %s1822_s26 }
0x1857   :  { %v1568_v22 = vpop.permute.xlu2 %1567 }
0x1870   :  { %v1490_v0 = vpop.f32.mrf.mxu0 }
0x1871   :  { %v1514_v45 = vadd.f32 %v1513_v39, %v1490_v0 }
0x1873   :  { %v1516_v40 = vadd.f32 %v1803_v50, %v1514_v45 }
0x1875   :  { %v1517_v41 = vmax.f32 %v1516_v40, 0.0 }
0x1877   :  { %1716 = vmatmul.msk.f32.vlgmr.msrb.gmra.mxu2 %vm107_vm0, %v1517_v41 }
0x18fa   :  { %v1538_v43 = vpop.f32.mrf.mxu2 }
0x18fb   :  { %v1539_v44 = vadd.f32 %v1538_v43, %v2079_v60  ;;  %v312_v60 = vperm.slane %v1803_v50, 2 }
0x18fd   :  { %v1561_v46 = vadd.f32 %v1559_v37, %v1539_v44 }
0x18ff   :  { %v1562_v47 = vmul.f32 0.5, %v1561_v46 }
0x1901   :  { %1771 = vtanh.f32 %v1562_v47 }
0x1907   :  { %v1772_v48 = vpop.eup %1771 }
0x1908   :  { %v1564_v16 = vadd.f32 1.0, %v1772_v48 }
0x190a   :  { %v1565_v20 = vmul.f32 0.5, %v1564_v16 }
0x190c   :  { %v1570_v38 = vmul.f32 %v1568_v22, %v1565_v20  ;;  %v1577_v53 = vsub.f32 1.0, %v1565_v20  ;;  %v1583_v56 = vmul.f32 %v1565_v20, %v2364_v2 }
0x190e   :  { %1572 = vrot.lane.b32.xlu2 %v1570_v38, %s1822_s26 }
0x1968   :  { %v1573_v49 = vpop.permute.xlu2 %1572 }
0x1969   :  { %v1575_v51 = vadd.f32 %v1573_v49, %v1539_v44 }
0x196b   :  { %1773 = vtanh.f32 %v1575_v51 }
0x1971   :  { %v1774_v52 = vpop.eup %1773 }
0x1972   :  { %1579 = vrot.lane.b32.xlu2 %v1774_v52, %s1820_s25 }
0x197a   :  { %313 = vrot.lane.b32.xlu2 %v2070_v57, %s1821_s5 }
0x1982   :  { %315 = vrot.lane.b32.xlu2 %v312_v60, %s1821_s5 }
0x19cc   :  { %v1580_v54 = vpop.permute.xlu2 %1579 }
0x19cd   :  { %v1582_v58 = vmul.f32 %v1580_v54, %v1577_v53 }
0x19cf   :  { %v1584_v15 = vadd.f32 %v1583_v56, %v1582_v58 }
0x19d1   :  { %1586 = vrot.lane.b32.xlu1 %v1584_v15, %s1820_s25 }
0x19d4   :  { %v314_v59 = vpop.permute.xlu2 %313 }
0x19dc   :  { %v316_v17 = vpop.permute.xlu2 %315 }
0x19dd   :  { %v317_v21 = vsel %vm107_vm0, %v314_v59, %v316_v17 }
0x19de   :  { %v592_v25 = vadd.f32 %v2222_v55, %v317_v21  ;;  %v339_v57 = vadd.f32 %v2161_v13, %v317_v21  ;;  %v1100_v33 = vadd.f32 %v2346_v42, %v317_v21  ;;  %v1354_v36 = vadd.f32 %v1353_v62, %v317_v21 }
0x19df   :  { %v846_v3 = vadd.f32 %v2283_v31, %v317_v21 }
0x19e0   :  { %v594_v61 = vsel %vm341_vm1, %v592_v25, -inf  ;;  %v342_v63 = vsel %vm341_vm1, %v339_v57, -inf  ;;  %v1102_v2 = vsel %vm341_vm1, %v1100_v33, -inf  ;;  %v1356_v1 = vsel %vm341_vm1, %v1354_v36, -inf }
0x19e1   :  { %595 = vmax.xlane.f32.xlu2 %v594_v61  ;;  %343 = vmax.xlane.f32.xlu0 %v342_v63  ;;  %v848_v55 = vsel %vm341_vm1, %v846_v3, -inf }
0x19e9   :  { %1103 = vmax.xlane.f32.xlu0 %v1102_v2 }
0x19f1   :  { %1357 = vmax.xlane.f32.xlu0 %v1356_v1 }
0x19fb   :  { %849 = vmax.xlane.f32.xlu1 %v848_v55 }
0x1a43   :  { %v1587_v13 = vpop.permute.xlu1 %1586 }
0x1a44   :  { %1720 = vst.msk [vmem:[%s2461_s10 + $0x5] sm:$0x1] %vm356_vm9, %v1587_v13  ;;  %1718 = vmatmul.msk.f32.vlgmr.msrb.gmra.mxu0 %vm107_vm0, %v1587_v13 }
0x1a54   :  { %v344_v42 = vpop.xlane.xlu0 %343  ;;  %v596_v7 = vpop.xlane.xlu2 %595 }
0x1a55   :  { %v345_v12 = vsub.f32 %v339_v57, %v344_v42  ;;  %v597_v29 = vsub.f32 %v592_v25, %v596_v7 }
0x1a57   :  { %v346_v18 = vmul.f32 1.442695, %v345_v12  ;;  %v598_v19 = vmul.f32 1.442695, %v597_v29 }
0x1a5c   :  { %v1104_v4 = vpop.xlane.xlu0 %1103 }
0x1a5d   :  { %v1105_v23 = vsub.f32 %v1100_v33, %v1104_v4 }
0x1a5f   :  { %v1106_v35 = vmul.f32 1.442695, %v1105_v23 }
0x1a64   :  { %v1358_v9 = vpop.xlane.xlu0 %1357 }
0x1a65   :  { %v1359_v5 = vsub.f32 %v1354_v36, %v1358_v9 }
0x1a67   :  { %v1360_v6 = vmul.f32 1.442695, %v1359_v5 }
0x1a69   :  { %1775 = vpow2.f32 %v1360_v6 }
0x1a6e   :  { %v850_v10 = vpop.xlane.xlu1 %849 }
0x1a6f   :  { %v1776_v14 = vpop.eup %1775  ;;  %v851_v31 = vsub.f32 %v846_v3, %v850_v10 }
0x1a70   :  { %v1362_v24 = vsel %vm341_vm1, %v1776_v14, 0.0 }
0x1a71   :  { %v852_v26 = vmul.f32 1.442695, %v851_v31  ;;  %1363 = vadd.xlane.f32.xlu1 %v1362_v24 }
0x1a73   :  { %1777 = vpow2.f32 %v852_v26 }
0x1a74   :  { %1779 = vpow2.f32 %v346_v18 }
0x1a75   :  { %1781 = vpow2.f32 %v598_v19 }
0x1a76   :  { %1783 = vpow2.f32 %v1106_v35 }
0x1a79   :  { %v1778_v27 = vpop.eup %1777 }
0x1a7a   :  { %v854_v11 = vsel %vm341_vm1, %v1778_v27, 0.0  ;;  %v1780_v32 = vpop.eup %1779 }
0x1a7b   :  { %855 = vadd.xlane.f32.xlu2 %v854_v11  ;;  %v348_v34 = vsel %vm341_vm1, %v1780_v32, 0.0  ;;  %v1782_v37 = vpop.eup %1781 }
0x1a7c   :  { %v600_v62 = vsel %vm341_vm1, %v1782_v37, 0.0  ;;  %v1784_v39 = vpop.eup %1783 }
0x1a7d   :  { %v1108_v0 = vsel %vm341_vm1, %v1784_v39, 0.0 }
0x1ac1   :  { %v1607_v8 = vpop.f32.mrf.mxu0 }
0x1ac2   :  { %v1608_v28 = vadd.f32 %v1607_v8, %v317_v21 }
0x1ac4   :  { %v1610_v30 = vsel %vm341_vm1, %v1608_v28, -inf }
0x1ac5   :  { %1611 = vmax.xlane.f32.xlu0 %v1610_v30 }
0x1acd   :  { %349 = vadd.xlane.f32.xlu0 %v348_v34 }
0x1ad5   :  { %601 = vadd.xlane.f32.xlu0 %v600_v62 }
0x1add   :  { %1109 = vadd.xlane.f32.xlu0 %v1108_v0 }
0x1ae4   :  { %v1364_v45 = vpop.xlane.xlu1 %1363 }
0x1ae5   :  { %1785 = vlog2.f32 %v1364_v45 }
0x1aeb   :  { %v1786_v50 = vpop.eup %1785 }
0x1aec   :  { %v1366_v40 = vmul.f32 0.6931472, %v1786_v50 }
0x1aee   :  { %v1367_v41 = vsub.f32 %v1359_v5, %v1366_v40  ;;  %v856_v43 = vpop.xlane.xlu2 %855 }
0x1aef   :  { %1787 = vlog2.f32 %v856_v43 }
0x1af0   :  { %1705 = vst.msk [vmem:[%s2460_s9 + $0x4] sm:$0x1] %vm341_vm1, %v1367_v41 }
0x1af5   :  { %v1788_v44 = vpop.eup %1787 }
0x1af6   :  { %v858_v46 = vmul.f32 0.6931472, %v1788_v44 }
0x1af8   :  { %v859_v47 = vsub.f32 %v851_v31, %v858_v46 }
0x1afa   :  { %1677 = vst.msk [vmem:[%s2460_s9 + $0x2] sm:$0x1] %vm341_vm1, %v859_v47 }
0x1b38   :  { %v1612_v48 = vpop.xlane.xlu0 %1611 }
0x1b39   :  { %v1613_v16 = vsub.f32 %v1608_v28, %v1612_v48 }
0x1b3b   :  { %v1614_v20 = vmul.f32 1.442695, %v1613_v16 }
0x1b3d   :  { %1789 = vpow2.f32 %v1614_v20 }
0x1b40   :  { %v350_v22 = vpop.xlane.xlu0 %349 }
0x1b41   :  { %1791 = vlog2.f32 %v350_v22 }
0x1b43   :  { %v1790_v38 = vpop.eup %1789 }
0x1b44   :  { %v1616_v49 = vsel %vm341_vm1, %v1790_v38, 0.0 }
0x1b45   :  { %1617 = vadd.xlane.f32.xlu2 %v1616_v49 }
0x1b47   :  { %v1792_v51 = vpop.eup %1791 }
0x1b48   :  { %v352_v52 = vmul.f32 0.6931472, %v1792_v51  ;;  %v602_v60 = vpop.xlane.xlu0 %601 }
0x1b49   :  { %1793 = vlog2.f32 %v602_v60 }
0x1b4a   :  { %v353_v53 = vsub.f32 %v345_v12, %v352_v52 }
0x1b4c   :  { %354 = vst.msk [vmem:[%s2460_s9] sm:$0x1] %vm341_vm1, %v353_v53 }
0x1b4f   :  { %v1794_v54 = vpop.eup %1793 }
0x1b50   :  { %v604_v56 = vmul.f32 0.6931472, %v1794_v54  ;;  %v1110_v58 = vpop.xlane.xlu0 %1109 }
0x1b51   :  { %1795 = vlog2.f32 %v1110_v58 }
0x1b52   :  { %v605_v15 = vsub.f32 %v597_v29, %v604_v56 }
0x1b54   :  { %1663 = vst.msk [vmem:[%s2460_s9 + $0x1] sm:$0x1] %vm341_vm1, %v605_v15 }
0x1b57   :  { %v1796_v59 = vpop.eup %1795 }
0x1b58   :  { %v1112_v17 = vmul.f32 0.6931472, %v1796_v59 }
0x1b5a   :  { %v1113_v21 = vsub.f32 %v1105_v23, %v1112_v17 }
0x1b5c   :  { %1691 = vst.msk [vmem:[%s2460_s9 + $0x3] sm:$0x1] %vm341_vm1, %v1113_v21 }
0x1bb8   :  { %v1618_v25 = vpop.xlane.xlu2 %1617 }
0x1bb9   :  { %1797 = vlog2.f32 %v1618_v25 }
0x1bbf   :  { %v1798_v57 = vpop.eup %1797 }
0x1bc0   :  { %v1620_v61 = vmul.f32 0.6931472, %v1798_v57 }
0x1bc2   :  { %v1621_v63 = vsub.f32 %v1613_v16, %v1620_v61 }
0x1bc4   :  { %1719 = vst.msk [vmem:[%s2460_s9 + $0x5] sm:$0x1] %vm341_vm1, %v1621_v63 }
0x1bc5   :  { %1641 = vsyncpa [#allocation3], 1 }

</bundles_post_ra>
